<compile_context>
chip_gen: v5e
topology: v5e:2x2
jax: 0.10.0
libtpu: 0.0.40
codegen_flags: <defaults>
</compile_context>

<pallas_src>
import functools
import numpy as np
import jax
import jax.numpy as jnp
from jax.experimental import pallas as pl
from jax.experimental.pallas import tpu as pltpu

LANES = 128


def _round_up(x, m):
    return (x + m - 1) // m * m


# ----------------------------------------------------------------------------
# Kernel 1: 1x1 conv + folded BN shift + ReLU   (y = relu(x @ W' + shift))
# ----------------------------------------------------------------------------
def _matmul_shift_relu_kernel(x_ref, w_ref, b_ref, o_ref):
    acc = jnp.dot(x_ref[...], w_ref[...], preferred_element_type=jnp.float32)
    o_ref[...] = jnp.maximum(acc + b_ref[...], 0.0)


def conv1x1_bn_relu(x2d, w, shift):
    """x2d: (M, Cin_p) channel-padded pixels; w: (Cin_p, Cout_p); shift: (1, Cout_p)."""
    M, K = x2d.shape
    Kp, Np = w.shape
    assert K == Kp
    TM = min(128, _round_up(M, 8))          # right-size the M tile (no forced 128-row tile)
    Mp = _round_up(M, TM)
    if Mp != M:
        x2d = jnp.pad(x2d, ((0, Mp - M), (0, 0)))
    out = pl.pallas_call(
        _matmul_shift_relu_kernel,
        out_shape=jax.ShapeDtypeStruct((Mp, Np), jnp.float32),
        grid=(Mp // TM,),
        in_specs=[
            pl.BlockSpec((TM, Kp), lambda i: (i, 0)),
            pl.BlockSpec((Kp, Np), lambda i: (0, 0)),
            pl.BlockSpec((1, Np), lambda i: (0, 0)),
        ],
        out_specs=pl.BlockSpec((TM, Np), lambda i: (i, 0)),
        compiler_params=pltpu.CompilerParams(dimension_semantics=("parallel",)),
    )(x2d, w, shift)
    if Mp != M:
        out = out[:M]
    return out


# ----------------------------------------------------------------------------
# Kernel 2: 3x3 stride-2 pad-1 conv + folded BN shift + ReLU, im2col fused
# ----------------------------------------------------------------------------
def _conv3x3_s2_kernel(p00_ref, p01_ref, p10_ref, p11_ref, w_ref, b_ref, o_ref,
                       *, Ho, Wo):
    # Parity images: p[r][c][n, i, j, :] == x_padded[n, 2*i + r, 2*j + c, :]
    parity = ((p00_ref, p01_ref), (p10_ref, p11_ref))
    C = w_ref.shape[1]
    Np = w_ref.shape[2]
    acc = jnp.zeros((Ho * Wo, Np), jnp.float32)
    for ki in range(3):                      # 9 in-kernel tap matmuls, accumulated in f32
        for kj in range(3):
            pref = parity[ki % 2][kj % 2]
            sub = pref[0, ki // 2:ki // 2 + Ho, kj // 2:kj // 2 + Wo, :]
            acc = acc + jnp.dot(sub.reshape(Ho * Wo, C), w_ref[ki * 3 + kj],
                                preferred_element_type=jnp.float32)
    y = jnp.maximum(acc + b_ref[...], 0.0)
    o_ref[0] = y.reshape(Ho, Wo, Np)


def conv3x3_s2_bn_relu(x, w9, shift):
    """x: (N, H, W, Cp) channel-padded; w9: (9, Cp, Cout_p); shift: (1, Cout_p)."""
    N, H, W, C = x.shape
    Np = w9.shape[2]
    Ho = (H - 1) // 2 + 1
    Wo = (W - 1) // 2 + 1
    # halo pad only (+ make padded extents even so the parity split is exact)
    ph = 1 + (H % 2)
    pw = 1 + (W % 2)
    xp = jnp.pad(x, ((0, 0), (1, ph), (1, pw), (0, 0)))
    Hh = (H + 1 + ph) // 2
    Wh = (W + 1 + pw) // 2
    # Parity decomposition: same total size as xp (no 9x im2col expansion); with it
    # every stride-2 tap window is a contiguous static slice inside the kernel.
    p00 = xp[:, 0::2, 0::2, :]
    p01 = xp[:, 0::2, 1::2, :]
    p10 = xp[:, 1::2, 0::2, :]
    p11 = xp[:, 1::2, 1::2, :]
    kernel = functools.partial(_conv3x3_s2_kernel, Ho=Ho, Wo=Wo)
    par_spec = pl.BlockSpec((1, Hh, Wh, C), lambda n: (n, 0, 0, 0))
    out = pl.pallas_call(
        kernel,
        out_shape=jax.ShapeDtypeStruct((N, Ho, Wo, Np), jnp.float32),
        grid=(N,),
        in_specs=[par_spec, par_spec, par_spec, par_spec,
                  pl.BlockSpec((9, C, Np), lambda n: (0, 0, 0)),
                  pl.BlockSpec((1, Np), lambda n: (0, 0))],
        out_specs=pl.BlockSpec((1, Ho, Wo, Np), lambda n: (n, 0, 0, 0)),
        compiler_params=pltpu.CompilerParams(dimension_semantics=("parallel",)),
    )(p00, p01, p10, p11, w9, shift)
    return out


# ----------------------------------------------------------------------------
# Deterministic parameter construction (conv weight + bias, BN folded, pre-padded)
# ----------------------------------------------------------------------------
class KeyGen:
    def __init__(self, seed=0):
        self._base = jax.random.PRNGKey(seed)
        self._i = 0

    def __call__(self):
        self._i += 1
        return jax.random.fold_in(self._base, self._i)


def init_conv_bn(kg, k, cin, cout, cin_p, cout_p):
    fan_in = k * k * cin
    W = jax.random.normal(kg(), (k, k, cin, cout), jnp.float32) * (0.5 / np.sqrt(fan_in))
    b = 0.05 * jax.random.normal(kg(), (cout,), jnp.float32)
    gamma = 1.0 + 0.1 * jax.random.normal(kg(), (cout,), jnp.float32)
    beta = 0.05 * jax.random.normal(kg(), (cout,), jnp.float32)
    mean = 0.05 * jax.random.normal(kg(), (cout,), jnp.float32)
    var = 1.0 + 0.1 * jnp.abs(jax.random.normal(kg(), (cout,), jnp.float32))
    s = gamma / jnp.sqrt(var + 1e-5)         # BN scale
    Wf = W * s                               # fold BN scale into conv weights
    shift = beta + (b - mean) * s            # folded conv bias + BN shift
    Wp = jnp.pad(Wf, ((0, 0), (0, 0), (0, cin_p - cin), (0, cout_p - cout)))
    shift_p = jnp.pad(shift, (0, cout_p - cout)).reshape(1, cout_p)
    Wk = Wp.reshape(cin_p, cout_p) if k == 1 else Wp.reshape(k * k, cin_p, cout_p)
    return {"W": Wk, "shift": shift_p,            # padded, scale-folded (kernel inputs)
            "W_ref": Wf, "shift_ref": shift,      # unpadded (pure-JAX reference)
            "k": k, "cout": cout}


def init_conv_block(seed, in_ch, out_ch):
    kg = KeyGen(seed)
    cin_p = _round_up(in_ch, LANES)
    cmid_p = _round_up(out_ch, LANES)
    return {"a": init_conv_bn(kg, 1, in_ch, out_ch, cin_p, cmid_p),
            "b": init_conv_bn(kg, 3, out_ch, out_ch, cmid_p, cmid_p),
            "in_ch": in_ch, "out_ch": out_ch}


# ----------------------------------------------------------------------------
# conv_block forward (two fused Pallas kernels, channel padding only at the ends)
# ----------------------------------------------------------------------------
def conv_block_forward(params, x_nchw):
    x = jnp.transpose(x_nchw, (0, 2, 3, 1)).astype(jnp.float32)   # NCHW -> NHWC
    N, H, W, Cin = x.shape
    cin_p = params["a"]["W"].shape[0]
    if cin_p != Cin:
        x = jnp.pad(x, ((0, 0), (0, 0), (0, 0), (0, cin_p - Cin)))  # pad channels once
    pa = params["a"]
    y1 = conv1x1_bn_relu(x.reshape(N * H * W, cin_p), pa["W"], pa["shift"])
    cmid_p = pa["W"].shape[1]
    y1 = y1.reshape(N, H, W, cmid_p)        # padded channels are exactly zero (shift padded w/ 0)
    pb = params["b"]
    y2 = conv3x3_s2_bn_relu(y1, pb["W"], pb["shift"])
    y2 = y2[..., :pb["cout"]]               # slice channels only once, at the output
    return jnp.transpose(y2, (0, 3, 1, 2))  # NHWC -> NCHW


def conv_block_reference(params, x_nchw):
    """Pure-JAX reference (same folded weights) to validate the Pallas path."""
    x = jnp.transpose(x_nchw, (0, 2, 3, 1)).astype(jnp.float32)

    def ref(x, p, stride, pad):
        dn = jax.lax.conv_dimension_numbers(x.shape, p["W_ref"].shape,
                                            ("NHWC", "HWIO", "NHWC"))
        y = jax.lax.conv_general_dilated(
            x, p["W_ref"], (stride, stride), [(pad, pad), (pad, pad)],
            dimension_numbers=dn, precision=jax.lax.Precision.HIGHEST)
        return jnp.maximum(y + p["shift_ref"], 0.0)

    y = ref(x, params["a"], 1, 0)
    y = ref(y, params["b"], 2, 1)
    return jnp.transpose(y, (0, 3, 1, 2))


if __name__ == "__main__":
    in_ch, out_ch = 4, 8
    params = init_conv_block(seed=0, in_ch=in_ch, out_ch=out_ch)
    x = jax.random.normal(jax.random.PRNGKey(0), (2, in_ch, 16, 16), jnp.float32)

    fwd = jax.jit(functools.partial(conv_block_forward, params))
    out = fwd(x)
    jax.block_until_ready(out)

    assert out.shape == (2, out_ch, 8, 8), out.shape
    assert bool(jnp.all(jnp.isfinite(out)))
    ref = conv_block_reference(params, x)
    err = float(jnp.max(jnp.abs(out - ref)))
    assert err < 3e-3, f"max abs error {err}"
    print("KERNEL_OK")
</pallas_src>

<mosaic_0001>
module attributes {stable_mosaic.version = 11 : i64} {
  func.func @_matmul_shift_relu_kernel(%arg0: i32, %arg1: memref<128x128xf32, #tpu.memory_space<vmem>>, %arg2: memref<128x128xf32, #tpu.memory_space<vmem>>, %arg3: memref<1x128xf32, #tpu.memory_space<vmem>>, %arg4: memref<128x128xf32, #tpu.memory_space<vmem>>) attributes {dimension_semantics = [#tpu.dimension_semantics<parallel>], iteration_bounds = array<i64: 4>, scalar_prefetch = 0 : i64, scratch_operands = 0 : i64, tpu.core_type = #tpu.core_type<tc>, window_params = [{transform_indices = @transform_0, window_bounds = array<i64: 128, 128>}, {pipeline_mode = #tpu.pipeline_mode<synchronous>, transform_indices = @transform_1, window_bounds = array<i64: 128, 128>}, {pipeline_mode = #tpu.pipeline_mode<synchronous>, transform_indices = @transform_2, window_bounds = array<i64: 1, 128>}, {transform_indices = @transform_3, window_bounds = array<i64: 128, 128>}]} {
    %c0 = arith.constant 0 : index
    %c0_0 = arith.constant 0 : index
    %0 = vector.load %arg1[%c0, %c0_0] : memref<128x128xf32, #tpu.memory_space<vmem>>, vector<128x128xf32>
    %c0_1 = arith.constant 0 : index
    %c0_2 = arith.constant 0 : index
    %1 = vector.load %arg2[%c0_1, %c0_2] : memref<128x128xf32, #tpu.memory_space<vmem>>, vector<128x128xf32>
    %cst = arith.constant dense<0.000000e+00> : vector<128x128xf32>
    %2 = tpu.matmul %0, %1, %cst {dimension_numbers = #tpu.dot_dimension_numbers<[1], [0], [0], [1], [0, 0, 1, 1], [], []>} : vector<128x128xf32>, vector<128x128xf32>, vector<128x128xf32> -> vector<128x128xf32>
    %c0_3 = arith.constant 0 : index
    %c0_4 = arith.constant 0 : index
    %3 = vector.load %arg3[%c0_3, %c0_4] : memref<1x128xf32, #tpu.memory_space<vmem>>, vector<1x128xf32>
    %4 = vector.broadcast %3 : vector<1x128xf32> to vector<128x128xf32>
    %5 = arith.addf %2, %4 : vector<128x128xf32>
    %cst_5 = arith.constant 0.000000e+00 : f32
    %6 = vector.broadcast %cst_5 : f32 to vector<128x128xf32>
    %7 = arith.maximumf %5, %6 : vector<128x128xf32>
    %c0_6 = arith.constant 0 : index
    %c0_7 = arith.constant 0 : index
    %8 = vector.load %arg4[%c0_6, %c0_7] : memref<128x128xf32, #tpu.memory_space<vmem>>, vector<128x128xf32>
    tpu.vector_store %arg4[%c0_6, %c0_7], %7 {strides = array<i32>} : memref<128x128xf32, #tpu.memory_space<vmem>>, vector<128x128xf32>,
    return
  }
  func.func @transform_0(%arg0: i32) -> (i32, i32) {
    %c0_i32 = arith.constant 0 : i32
    %c0_i32_0 = arith.constant 0 : i32
    return %arg0, %c0_i32 : i32, i32
  }
  func.func @transform_1(%arg0: i32) -> (i32, i32) {
    %c0_i32 = arith.constant 0 : i32
    %c0_i32_0 = arith.constant 0 : i32
    %c0_i32_1 = arith.constant 0 : i32
    return %c0_i32, %c0_i32_0 : i32, i32
  }
  func.func @transform_2(%arg0: i32) -> (i32, i32) {
    %c0_i32 = arith.constant 0 : i32
    %c0_i32_0 = arith.constant 0 : i32
    %c0_i32_1 = arith.constant 0 : i32
    return %c0_i32, %c0_i32_0 : i32, i32
  }
  func.func @transform_3(%arg0: i32) -> (i32, i32) {
    %c0_i32 = arith.constant 0 : i32
    %c0_i32_0 = arith.constant 0 : i32
    return %arg0, %c0_i32 : i32, i32
  }
}

module attributes {stable_mosaic.version = 11 : i64} {
  func.func @_conv3x3_s2_kernel(%arg0: i32, %arg1: memref<1x9x9x128xf32, #tpu.memory_space<vmem>>, %arg2: memref<1x9x9x128xf32, #tpu.memory_space<vmem>>, %arg3: memref<1x9x9x128xf32, #tpu.memory_space<vmem>>, %arg4: memref<1x9x9x128xf32, #tpu.memory_space<vmem>>, %arg5: memref<9x128x128xf32, #tpu.memory_space<vmem>>, %arg6: memref<1x128xf32, #tpu.memory_space<vmem>>, %arg7: memref<1x8x8x128xf32, #tpu.memory_space<vmem>>) attributes {dimension_semantics = [#tpu.dimension_semantics<parallel>], iteration_bounds = array<i64: 2>, scalar_prefetch = 0 : i64, scratch_operands = 0 : i64, tpu.core_type = #tpu.core_type<tc>, window_params = [{transform_indices = @transform_0, window_bounds = array<i64: 1, 9, 9, 128>}, {transform_indices = @transform_1, window_bounds = array<i64: 1, 9, 9, 128>}, {transform_indices = @transform_2, window_bounds = array<i64: 1, 9, 9, 128>}, {transform_indices = @transform_3, window_bounds = array<i64: 1, 9, 9, 128>}, {pipeline_mode = #tpu.pipeline_mode<synchronous>, transform_indices = @transform_4, window_bounds = array<i64: 9, 128, 128>}, {pipeline_mode = #tpu.pipeline_mode<synchronous>, transform_indices = @transform_5, window_bounds = array<i64: 1, 128>}, {transform_indices = @transform_6, window_bounds = array<i64: 1, 8, 8, 128>}]} {
    %cst = arith.constant 0.000000e+00 : f32
    %0 = vector.broadcast %cst : f32 to vector<64x128xf32>
    %c0 = arith.constant 0 : index
    %c0_0 = arith.constant 0 : index
    %c0_1 = arith.constant 0 : index
    %c0_2 = arith.constant 0 : index
    %1 = vector.load %arg1[%c0, %c0_0, %c0_1, %c0_2] : memref<1x9x9x128xf32, #tpu.memory_space<vmem>>, vector<1x8x8x128xf32>
    %2 = vector.shape_cast %1 : vector<1x8x8x128xf32> to vector<8x8x128xf32>
    %3 = vector.shape_cast %2 : vector<8x8x128xf32> to vector<64x128xf32>
    %c0_3 = arith.constant 0 : index
    %c0_4 = arith.constant 0 : index
    %c0_5 = arith.constant 0 : index
    %4 = vector.load %arg5[%c0_3, %c0_4, %c0_5] : memref<9x128x128xf32, #tpu.memory_space<vmem>>, vector<1x128x128xf32>
    %5 = vector.shape_cast %4 : vector<1x128x128xf32> to vector<128x128xf32>
    %cst_6 = arith.constant dense<0.000000e+00> : vector<64x128xf32>
    %6 = tpu.matmul %3, %5, %cst_6 {dimension_numbers = #tpu.dot_dimension_numbers<[1], [0], [0], [1], [0, 0, 1, 1], [], []>} : vector<64x128xf32>, vector<128x128xf32>, vector<64x128xf32> -> vector<64x128xf32>
    %7 = arith.addf %0, %6 : vector<64x128xf32>
    %c0_7 = arith.constant 0 : index
    %c0_8 = arith.constant 0 : index
    %c0_9 = arith.constant 0 : index
    %c0_10 = arith.constant 0 : index
    %8 = vector.load %arg2[%c0_7, %c0_8, %c0_9, %c0_10] : memref<1x9x9x128xf32, #tpu.memory_space<vmem>>, vector<1x8x8x128xf32>
    %9 = vector.shape_cast %8 : vector<1x8x8x128xf32> to vector<8x8x128xf32>
    %10 = vector.shape_cast %9 : vector<8x8x128xf32> to vector<64x128xf32>
    %c1 = arith.constant 1 : index
    %c0_11 = arith.constant 0 : index
    %c0_12 = arith.constant 0 : index
    %11 = vector.load %arg5[%c1, %c0_11, %c0_12] : memref<9x128x128xf32, #tpu.memory_space<vmem>>, vector<1x128x128xf32>
    %12 = vector.shape_cast %11 : vector<1x128x128xf32> to vector<128x128xf32>
    %cst_13 = arith.constant dense<0.000000e+00> : vector<64x128xf32>
    %13 = tpu.matmul %10, %12, %cst_13 {dimension_numbers = #tpu.dot_dimension_numbers<[1], [0], [0], [1], [0, 0, 1, 1], [], []>} : vector<64x128xf32>, vector<128x128xf32>, vector<64x128xf32> -> vector<64x128xf32>
    %14 = arith.addf %7, %13 : vector<64x128xf32>
    %c0_14 = arith.constant 0 : index
    %c0_15 = arith.constant 0 : index
    %c1_16 = arith.constant 1 : index
    %c0_17 = arith.constant 0 : index
    %15 = vector.load %arg1[%c0_14, %c0_15, %c1_16, %c0_17] : memref<1x9x9x128xf32, #tpu.memory_space<vmem>>, vector<1x8x8x128xf32>
    %16 = vector.shape_cast %15 : vector<1x8x8x128xf32> to vector<8x8x128xf32>
    %17 = vector.shape_cast %16 : vector<8x8x128xf32> to vector<64x128xf32>
    %c2 = arith.constant 2 : index
    %c0_18 = arith.constant 0 : index
    %c0_19 = arith.constant 0 : index
    %18 = vector.load %arg5[%c2, %c0_18, %c0_19] : memref<9x128x128xf32, #tpu.memory_space<vmem>>, vector<1x128x128xf32>
    %19 = vector.shape_cast %18 : vector<1x128x128xf32> to vector<128x128xf32>
    %cst_20 = arith.constant dense<0.000000e+00> : vector<64x128xf32>
    %20 = tpu.matmul %17, %19, %cst_20 {dimension_numbers = #tpu.dot_dimension_numbers<[1], [0], [0], [1], [0, 0, 1, 1], [], []>} : vector<64x128xf32>, vector<128x128xf32>, vector<64x128xf32> -> vector<64x128xf32>
    %21 = arith.addf %14, %20 : vector<64x128xf32>
    %c0_21 = arith.constant 0 : index
    %c0_22 = arith.constant 0 : index
    %c0_23 = arith.constant 0 : index
    %c0_24 = arith.constant 0 : index
    %22 = vector.load %arg3[%c0_21, %c0_22, %c0_23, %c0_24] : memref<1x9x9x128xf32, #tpu.memory_space<vmem>>, vector<1x8x8x128xf32>
    %23 = vector.shape_cast %22 : vector<1x8x8x128xf32> to vector<8x8x128xf32>
    %24 = vector.shape_cast %23 : vector<8x8x128xf32> to vector<64x128xf32>
    %c3 = arith.constant 3 : index
    %c0_25 = arith.constant 0 : index
    %c0_26 = arith.constant 0 : index
    %25 = vector.load %arg5[%c3, %c0_25, %c0_26] : memref<9x128x128xf32, #tpu.memory_space<vmem>>, vector<1x128x128xf32>
    %26 = vector.shape_cast %25 : vector<1x128x128xf32> to vector<128x128xf32>
    %cst_27 = arith.constant dense<0.000000e+00> : vector<64x128xf32>
    %27 = tpu.matmul %24, %26, %cst_27 {dimension_numbers = #tpu.dot_dimension_numbers<[1], [0], [0], [1], [0, 0, 1, 1], [], []>} : vector<64x128xf32>, vector<128x128xf32>, vector<64x128xf32> -> vector<64x128xf32>
    %28 = arith.addf %21, %27 : vector<64x128xf32>
    %c0_28 = arith.constant 0 : index
    %c0_29 = arith.constant 0 : index
    %c0_30 = arith.constant 0 : index
    %c0_31 = arith.constant 0 : index
    %29 = vector.load %arg4[%c0_28, %c0_29, %c0_30, %c0_31] : memref<1x9x9x128xf32, #tpu.memory_space<vmem>>, vector<1x8x8x128xf32>
    %30 = vector.shape_cast %29 : vector<1x8x8x128xf32> to vector<8x8x128xf32>
    %31 = vector.shape_cast %30 : vector<8x8x128xf32> to vector<64x128xf32>
    %c4 = arith.constant 4 : index
    %c0_32 = arith.constant 0 : index
    %c0_33 = arith.constant 0 : index
    %32 = vector.load %arg5[%c4, %c0_32, %c0_33] : memref<9x128x128xf32, #tpu.memory_space<vmem>>, vector<1x128x128xf32>
    %33 = vector.shape_cast %32 : vector<1x128x128xf32> to vector<128x128xf32>
    %cst_34 = arith.constant dense<0.000000e+00> : vector<64x128xf32>
    %34 = tpu.matmul %31, %33, %cst_34 {dimension_numbers = #tpu.dot_dimension_numbers<[1], [0], [0], [1], [0, 0, 1, 1], [], []>} : vector<64x128xf32>, vector<128x128xf32>, vector<64x128xf32> -> vector<64x128xf32>
    %35 = arith.addf %28, %34 : vector<64x128xf32>
    %c0_35 = arith.constant 0 : index
    %c0_36 = arith.constant 0 : index
    %c1_37 = arith.constant 1 : index
    %c0_38 = arith.constant 0 : index
    %36 = vector.load %arg3[%c0_35, %c0_36, %c1_37, %c0_38] : memref<1x9x9x128xf32, #tpu.memory_space<vmem>>, vector<1x8x8x128xf32>
    %37 = vector.shape_cast %36 : vector<1x8x8x128xf32> to vector<8x8x128xf32>
    %38 = vector.shape_cast %37 : vector<8x8x128xf32> to vector<64x128xf32>
    %c5 = arith.constant 5 : index
    %c0_39 = arith.constant 0 : index
    %c0_40 = arith.constant 0 : index
    %39 = vector.load %arg5[%c5, %c0_39, %c0_40] : memref<9x128x128xf32, #tpu.memory_space<vmem>>, vector<1x128x128xf32>
    %40 = vector.shape_cast %39 : vector<1x128x128xf32> to vector<128x128xf32>
    %cst_41 = arith.constant dense<0.000000e+00> : vector<64x128xf32>
    %41 = tpu.matmul %38, %40, %cst_41 {dimension_numbers = #tpu.dot_dimension_numbers<[1], [0], [0], [1], [0, 0, 1, 1], [], []>} : vector<64x128xf32>, vector<128x128xf32>, vector<64x128xf32> -> vector<64x128xf32>
    %42 = arith.addf %35, %41 : vector<64x128xf32>
    %c0_42 = arith.constant 0 : index
    %c1_43 = arith.constant 1 : index
    %c0_44 = arith.constant 0 : index
    %c0_45 = arith.constant 0 : index
    %43 = vector.load %arg1[%c0_42, %c1_43, %c0_44, %c0_45] : memref<1x9x9x128xf32, #tpu.memory_space<vmem>>, vector<1x8x8x128xf32>
    %44 = vector.shape_cast %43 : vector<1x8x8x128xf32> to vector<8x8x128xf32>
    %45 = vector.shape_cast %44 : vector<8x8x128xf32> to vector<64x128xf32>
    %c6 = arith.constant 6 : index
    %c0_46 = arith.constant 0 : index
    %c0_47 = arith.constant 0 : index
    %46 = vector.load %arg5[%c6, %c0_46, %c0_47] : memref<9x128x128xf32, #tpu.memory_space<vmem>>, vector<1x128x128xf32>
    %47 = vector.shape_cast %46 : vector<1x128x128xf32> to vector<128x128xf32>
    %cst_48 = arith.constant dense<0.000000e+00> : vector<64x128xf32>
    %48 = tpu.matmul %45, %47, %cst_48 {dimension_numbers = #tpu.dot_dimension_numbers<[1], [0], [0], [1], [0, 0, 1, 1], [], []>} : vector<64x128xf32>, vector<128x128xf32>, vector<64x128xf32> -> vector<64x128xf32>
    %49 = arith.addf %42, %48 : vector<64x128xf32>
    %c0_49 = arith.constant 0 : index
    %c1_50 = arith.constant 1 : index
    %c0_51 = arith.constant 0 : index
    %c0_52 = arith.constant 0 : index
    %50 = vector.load %arg2[%c0_49, %c1_50, %c0_51, %c0_52] : memref<1x9x9x128xf32, #tpu.memory_space<vmem>>, vector<1x8x8x128xf32>
    %51 = vector.shape_cast %50 : vector<1x8x8x128xf32> to vector<8x8x128xf32>
    %52 = vector.shape_cast %51 : vector<8x8x128xf32> to vector<64x128xf32>
    %c7 = arith.constant 7 : index
    %c0_53 = arith.constant 0 : index
    %c0_54 = arith.constant 0 : index
    %53 = vector.load %arg5[%c7, %c0_53, %c0_54] : memref<9x128x128xf32, #tpu.memory_space<vmem>>, vector<1x128x128xf32>
    %54 = vector.shape_cast %53 : vector<1x128x128xf32> to vector<128x128xf32>
    %cst_55 = arith.constant dense<0.000000e+00> : vector<64x128xf32>
    %55 = tpu.matmul %52, %54, %cst_55 {dimension_numbers = #tpu.dot_dimension_numbers<[1], [0], [0], [1], [0, 0, 1, 1], [], []>} : vector<64x128xf32>, vector<128x128xf32>, vector<64x128xf32> -> vector<64x128xf32>
    %56 = arith.addf %49, %55 : vector<64x128xf32>
    %c0_56 = arith.constant 0 : index
    %c1_57 = arith.constant 1 : index
    %c1_58 = arith.constant 1 : index
    %c0_59 = arith.constant 0 : index
    %57 = vector.load %arg1[%c0_56, %c1_57, %c1_58, %c0_59] : memref<1x9x9x128xf32, #tpu.memory_space<vmem>>, vector<1x8x8x128xf32>
    %58 = vector.shape_cast %57 : vector<1x8x8x128xf32> to vector<8x8x128xf32>
    %59 = vector.shape_cast %58 : vector<8x8x128xf32> to vector<64x128xf32>
    %c8 = arith.constant 8 : index
    %c0_60 = arith.constant 0 : index
    %c0_61 = arith.constant 0 : index
    %60 = vector.load %arg5[%c8, %c0_60, %c0_61] : memref<9x128x128xf32, #tpu.memory_space<vmem>>, vector<1x128x128xf32>
    %61 = vector.shape_cast %60 : vector<1x128x128xf32> to vector<128x128xf32>
    %cst_62 = arith.constant dense<0.000000e+00> : vector<64x128xf32>
    %62 = tpu.matmul %59, %61, %cst_62 {dimension_numbers = #tpu.dot_dimension_numbers<[1], [0], [0], [1], [0, 0, 1, 1], [], []>} : vector<64x128xf32>, vector<128x128xf32>, vector<64x128xf32> -> vector<64x128xf32>
    %63 = arith.addf %56, %62 : vector<64x128xf32>
    %c0_63 = arith.constant 0 : index
    %c0_64 = arith.constant 0 : index
    %64 = vector.load %arg6[%c0_63, %c0_64] : memref<1x128xf32, #tpu.memory_space<vmem>>, vector<1x128xf32>
    %65 = vector.broadcast %64 : vector<1x128xf32> to vector<64x128xf32>
    %66 = arith.addf %63, %65 : vector<64x128xf32>
    %cst_65 = arith.constant 0.000000e+00 : f32
    %67 = vector.broadcast %cst_65 : f32 to vector<64x128xf32>
    %68 = arith.maximumf %66, %67 : vector<64x128xf32>
    %69 = vector.shape_cast %68 : vector<64x128xf32> to vector<8x8x128xf32>
    %c0_66 = arith.constant 0 : index
    %c0_67 = arith.constant 0 : index
    %c0_68 = arith.constant 0 : index
    %c0_69 = arith.constant 0 : index
    %70 = vector.load %arg7[%c0_66, %c0_67, %c0_68, %c0_69] : memref<1x8x8x128xf32, #tpu.memory_space<vmem>>, vector<1x8x8x128xf32>
    %71 = vector.shape_cast %70 : vector<1x8x8x128xf32> to vector<8x8x128xf32>
    %72 = vector.shape_cast %69 : vector<8x8x128xf32> to vector<1x8x8x128xf32>
    tpu.vector_store %arg7[%c0_66, %c0_67, %c0_68, %c0_69], %72 {strides = array<i32>} : memref<1x8x8x128xf32, #tpu.memory_space<vmem>>, vector<1x8x8x128xf32>,
    return
  }
  func.func @transform_0(%arg0: i32) -> (i32, i32, i32, i32) {
    %c0_i32 = arith.constant 0 : i32
    %c0_i32_0 = arith.constant 0 : i32
    %c0_i32_1 = arith.constant 0 : i32
    %c0_i32_2 = arith.constant 0 : i32
    return %arg0, %c0_i32, %c0_i32_0, %c0_i32_1 : i32, i32, i32, i32
  }
  func.func @transform_1(%arg0: i32) -> (i32, i32, i32, i32) {
    %c0_i32 = arith.constant 0 : i32
    %c0_i32_0 = arith.constant 0 : i32
    %c0_i32_1 = arith.constant 0 : i32
    %c0_i32_2 = arith.constant 0 : i32
    return %arg0, %c0_i32, %c0_i32_0, %c0_i32_1 : i32, i32, i32, i32
  }
  func.func @transform_2(%arg0: i32) -> (i32, i32, i32, i32) {
    %c0_i32 = arith.constant 0 : i32
    %c0_i32_0 = arith.constant 0 : i32
    %c0_i32_1 = arith.constant 0 : i32
    %c0_i32_2 = arith.constant 0 : i32
    return %arg0, %c0_i32, %c0_i32_0, %c0_i32_1 : i32, i32, i32, i32
  }
  func.func @transform_3(%arg0: i32) -> (i32, i32, i32, i32) {
    %c0_i32 = arith.constant 0 : i32
    %c0_i32_0 = arith.constant 0 : i32
    %c0_i32_1 = arith.constant 0 : i32
    %c0_i32_2 = arith.constant 0 : i32
    return %arg0, %c0_i32, %c0_i32_0, %c0_i32_1 : i32, i32, i32, i32
  }
  func.func @transform_4(%arg0: i32) -> (i32, i32, i32) {
    %c0_i32 = arith.constant 0 : i32
    %c0_i32_0 = arith.constant 0 : i32
    %c0_i32_1 = arith.constant 0 : i32
    %c0_i32_2 = arith.constant 0 : i32
    return %c0_i32, %c0_i32_0, %c0_i32_1 : i32, i32, i32
  }
  func.func @transform_5(%arg0: i32) -> (i32, i32) {
    %c0_i32 = arith.constant 0 : i32
    %c0_i32_0 = arith.constant 0 : i32
    %c0_i32_1 = arith.constant 0 : i32
    return %c0_i32, %c0_i32_0 : i32, i32
  }
  func.func @transform_6(%arg0: i32) -> (i32, i32, i32, i32) {
    %c0_i32 = arith.constant 0 : i32
    %c0_i32_0 = arith.constant 0 : i32
    %c0_i32_1 = arith.constant 0 : i32
    %c0_i32_2 = arith.constant 0 : i32
    return %arg0, %c0_i32, %c0_i32_0, %c0_i32_1 : i32, i32, i32, i32
  }
}

</mosaic_0001>

<bundles_post_ra>
// kernel: conv_block_forward.2
= control target key start
LH: loop header
LB: loop body
LE: loop exit
PB: predicated region body
PF: predicated region fallthrough
CT: control target
= control target key end

     0   :  { %s459_s12 = smov 0   ;;  %s572_s0 = inlined_call_operand.vmem [shape: f32[512,128], index: 0, kind: input, shape index: {}]   ;;  %s573_s1 = inlined_call_operand.vmem [shape: f32[128,128], index: 1, kind: input, shape index: {}]   ;;  %s574_s2 = inlined_call_operand.vmem [shape: f32[1,128], index: 2, kind: input, shape index: {}]   ;;  %s575_s3 = inlined_call_operand.vmem [shape: f32[512,128], index: 3, kind: output, shape index: {}]  }
   0x1 LB: > { %s363_s13 = sadd.s32 4294967295, %s437_s12   ;;  %p367_p0 = scmp.ge.s32.totalorder %s437_s12, 1  ;;  %s437_s12 = sphi %s459_s12, %s13_s12  }
   0x2   : > { %p138_p1 = scmp.lt.s32.totalorder %s437_s12, 5 }
   0x4   : > { %p139_p2 = pnand %p367_p0, %p138_p1 }
   0x5   : > { %s368_s30 = sshll.u32 (!%p139_p2), %s363_s13, 4 }
   0x6   : > { %142 = sbr.rel (%p139_p2) target bundleno = 205 (0xcd), region = 32  ;;  %p163_p3 = scmp.lt.s32.totalorder (!%p139_p2), %s368_s30, 63 }
   0xb   : > { %v205_v0 = vld [vmem:[%s573_s1 + $0x78] sm:$0xff]  ;;  %v204_v1 = vld [vmem:[%s573_s1 + $0x70] sm:$0xff]  ;;  %v203_v2 = vld [vmem:[%s573_s1 + $0x68] sm:$0xff]  ;;  %s577_s30 = smov (!%p163_p3, %s368_s30), 63 }
   0xc   : > { %375 = vmatpush.msra.mxu2 %v205_v0  ;;  %376 = vmatpush.msra.mxu3 %v205_v0  ;;  %v202_v3 = vld [vmem:[%s573_s1 + $0x60] sm:$0xff]  ;;  %v201_v4 = vld [vmem:[%s573_s1 + $0x58] sm:$0xff]  ;;  %v200_v5 = vld [vmem:[%s573_s1 + $0x50] sm:$0xff]  ;;  %s369_s15 = sshll.u32 %s577_s30, 3 }
   0xd   : > { %210 = vmatpush.msra.mxu0 %v205_v0  ;;  %374 = vmatpush.msra.mxu1 %v205_v0  ;;  %v199_v6 = vld [vmem:[%s573_s1 + $0x48] sm:$0xff]  ;;  %v198_v7 = vld [vmem:[%s573_s1 + $0x40] sm:$0xff]  ;;  %v197_v8 = vld [vmem:[%s573_s1 + $0x38] sm:$0xff]  ;;  %s522_s22 = scalar_lea.vmem %s572_s0, %s369_s15  ;;  %s551_s29 = scalar_lea.vmem %s575_s3, %s369_s15 }
   0xe   : > { %378 = vmatpush.msra.mxu2 %v204_v1  ;;  %379 = vmatpush.msra.mxu3 %v204_v1  ;;  %v196_v9 = vld [vmem:[%s573_s1 + $0x30] sm:$0xff]  ;;  %v195_v10 = vld [vmem:[%s573_s1 + $0x28] sm:$0xff]  ;;  %v194_v11 = vld [vmem:[%s573_s1 + $0x20] sm:$0xff] }
   0xf   : > { %211 = vmatpush.msra.mxu0 %v204_v1  ;;  %377 = vmatpush.msra.mxu1 %v204_v1  ;;  %v193_v12 = vld [vmem:[%s573_s1 + $0x18] sm:$0xff]  ;;  %v192_v13 = vld [vmem:[%s573_s1 + $0x10] sm:$0xff]  ;;  %v191_v14 = vld [vmem:[%s573_s1 + $0x8] sm:$0xff] }
  0x10   : > { %381 = vmatpush.msra.mxu2 %v203_v2  ;;  %382 = vmatpush.msra.mxu3 %v203_v2  ;;  %v190_v15 = vld [vmem:[%s573_s1] sm:$0xff]  ;;  %v183_v20 = vld [vmem:[%s522_s22 + $0x48] sm:$0xff]  ;;  %v184_v24 = vld [vmem:[%s522_s22 + $0x50] sm:$0xff] }
  0x11   : > { %212 = vmatpush.msra.mxu0 %v203_v2  ;;  %380 = vmatpush.msra.mxu1 %v203_v2  ;;  %v182_v16 = vld [vmem:[%s522_s22 + $0x40] sm:$0xff]  ;;  %v187_v21 = vld [vmem:[%s522_s22 + $0x68] sm:$0xff]  ;;  %v188_v25 = vld [vmem:[%s522_s22 + $0x70] sm:$0xff] }
  0x12   : > { %384 = vmatpush.msra.mxu2 %v202_v3  ;;  %385 = vmatpush.msra.mxu3 %v202_v3  ;;  %v186_v17 = vld [vmem:[%s522_s22 + $0x60] sm:$0xff]  ;;  %v175_v22 = vld [vmem:[%s522_s22 + $0x8] sm:$0xff]  ;;  %v176_v26 = vld [vmem:[%s522_s22 + $0x10] sm:$0xff] }
  0x13   : > { %213 = vmatpush.msra.mxu0 %v202_v3  ;;  %383 = vmatpush.msra.mxu1 %v202_v3  ;;  %v174_v18 = vld [vmem:[%s522_s22] sm:$0xff]  ;;  %v179_v23 = vld [vmem:[%s522_s22 + $0x28] sm:$0xff]  ;;  %v180_v27 = vld [vmem:[%s522_s22 + $0x30] sm:$0xff] }
  0x14   : > { %387 = vmatpush.msra.mxu2 %v201_v4  ;;  %388 = vmatpush.msra.mxu3 %v201_v4  ;;  %v178_v19 = vld [vmem:[%s522_s22 + $0x20] sm:$0xff]  ;;  %v185_v28 = vld [vmem:[%s522_s22 + $0x58] sm:$0xff] }
  0x15   : > { %214 = vmatpush.msra.mxu0 %v201_v4  ;;  %386 = vmatpush.msra.mxu1 %v201_v4  ;;  %v189_v29 = vld [vmem:[%s522_s22 + $0x78] sm:$0xff]  ;;  %v430_v32 = vld [vmem:[%s574_s2] ss:$0 sm:$0xff] }
  0x16   : > { %390 = vmatpush.msra.mxu2 %v200_v5  ;;  %391 = vmatpush.msra.mxu3 %v200_v5  ;;  %v177_v30 = vld [vmem:[%s522_s22 + $0x18] sm:$0xff] }
  0x17   : > { %215 = vmatpush.msra.mxu0 %v200_v5  ;;  %389 = vmatpush.msra.mxu1 %v200_v5  ;;  %v181_v31 = vld [vmem:[%s522_s22 + $0x38] sm:$0xff] }
  0x18   : > { %393 = vmatpush.msra.mxu2 %v199_v6  ;;  %394 = vmatpush.msra.mxu3 %v199_v6 }
  0x19   : > { %216 = vmatpush.msra.mxu0 %v199_v6  ;;  %392 = vmatpush.msra.mxu1 %v199_v6 }
  0x1a   : > { %396 = vmatpush.msra.mxu2 %v198_v7  ;;  %397 = vmatpush.msra.mxu3 %v198_v7 }
  0x1b   : > { %217 = vmatpush.msra.mxu0 %v198_v7  ;;  %395 = vmatpush.msra.mxu1 %v198_v7 }
  0x1c   : > { %399 = vmatpush.msra.mxu2 %v197_v8  ;;  %400 = vmatpush.msra.mxu3 %v197_v8 }
  0x1d   : > { %218 = vmatpush.msra.mxu0 %v197_v8  ;;  %398 = vmatpush.msra.mxu1 %v197_v8 }
  0x1e   : > { %402 = vmatpush.msra.mxu2 %v196_v9  ;;  %403 = vmatpush.msra.mxu3 %v196_v9 }
  0x1f   : > { %219 = vmatpush.msra.mxu0 %v196_v9  ;;  %401 = vmatpush.msra.mxu1 %v196_v9 }
  0x20   : > { %405 = vmatpush.msra.mxu2 %v195_v10  ;;  %406 = vmatpush.msra.mxu3 %v195_v10 }
  0x21   : > { %220 = vmatpush.msra.mxu0 %v195_v10  ;;  %404 = vmatpush.msra.mxu1 %v195_v10 }
  0x22   : > { %408 = vmatpush.msra.mxu2 %v194_v11  ;;  %409 = vmatpush.msra.mxu3 %v194_v11 }
  0x23   : > { %221 = vmatpush.msra.mxu0 %v194_v11  ;;  %407 = vmatpush.msra.mxu1 %v194_v11 }
  0x24   : > { %411 = vmatpush.msra.mxu2 %v193_v12  ;;  %412 = vmatpush.msra.mxu3 %v193_v12 }
  0x25   : > { %222 = vmatpush.msra.mxu0 %v193_v12  ;;  %410 = vmatpush.msra.mxu1 %v193_v12 }
  0x26   : > { %414 = vmatpush.msra.mxu2 %v192_v13  ;;  %415 = vmatpush.msra.mxu3 %v192_v13 }
  0x27   : > { %223 = vmatpush.msra.mxu0 %v192_v13  ;;  %413 = vmatpush.msra.mxu1 %v192_v13 }
  0x28   : > { %417 = vmatpush.msra.mxu2 %v191_v14  ;;  %418 = vmatpush.msra.mxu3 %v191_v14 }
  0x29   : > { %224 = vmatpush.msra.mxu0 %v191_v14  ;;  %416 = vmatpush.msra.mxu1 %v191_v14 }
  0x2a   : > { %420 = vmatpush.msra.mxu2 %v190_v15  ;;  %421 = vmatpush.msra.mxu3 %v190_v15 }
  0x2b   : > { %250 = vmatmul.f32.vlgmr.msra.gmra.mxu2 %v182_v16  ;;  %262 = vmatmul.f32.vlgmr.msra.gmra.mxu3 %v186_v17 }
  0x2c   : > { %225 = vmatpush.msra.mxu0 %v190_v15  ;;  %419 = vmatpush.msra.mxu1 %v190_v15 }
  0x2d   : > { %226 = vmatmul.f32.vlgmr.msra.gmra.mxu0 %v174_v18  ;;  %238 = vmatmul.f32.vlgmr.msra.gmra.mxu1 %v178_v19 }
  0x33   : > { %253 = vmatmul.f32.gmra.mxu2 %v183_v20  ;;  %265 = vmatmul.f32.gmra.mxu3 %v187_v21 }
  0x35   : > { %229 = vmatmul.f32.gmra.mxu0 %v175_v22  ;;  %241 = vmatmul.f32.gmra.mxu1 %v179_v23 }
  0x3b   : > { %256 = vmatmul.f32.gmra.mxu2 %v184_v24  ;;  %268 = vmatmul.f32.gmra.mxu3 %v188_v25 }
  0x3d   : > { %232 = vmatmul.f32.gmra.mxu0 %v176_v26  ;;  %244 = vmatmul.f32.gmra.mxu1 %v180_v27 }
  0x43   : > { %259 = vmatmul.f32.gmra.mxu2 %v185_v28  ;;  %271 = vmatmul.f32.gmra.mxu3 %v189_v29 }
  0x45   : > { %235 = vmatmul.f32.gmra.mxu0 %v177_v30  ;;  %247 = vmatmul.f32.gmra.mxu1 %v181_v31 }
  0xaa   : > { %v227_v33 = vpop.f32.mrf.mxu0  ;;  %v239_v34 = vpop.f32.mrf.mxu1 }
  0xab   : > { %v228_v35 = vadd.f32 %v430_v32, %v227_v33  ;;  %v240_v36 = vadd.f32 %v430_v32, %v239_v34 }
  0xad   : > { %v275_v37 = vmax.f32 %v228_v35, 0.0  ;;  %v279_v38 = vmax.f32 %v240_v36, 0.0 }
  0xae   : > { %v251_v39 = vpop.f32.mrf.mxu2  ;;  %v263_v40 = vpop.f32.mrf.mxu3 }
  0xaf   : > { %291 = vst [vmem:[%s551_s29] sm:$0xff] %v275_v37  ;;  %v252_v41 = vadd.f32 %v430_v32, %v251_v39  ;;  %v264_v42 = vadd.f32 %v430_v32, %v263_v40 }
  0xb0   : > { %295 = vst [vmem:[%s551_s29 + $0x20] sm:$0xff] %v279_v38 }
  0xb1   : > { %v283_v43 = vmax.f32 %v252_v41, 0.0  ;;  %v287_v44 = vmax.f32 %v264_v42, 0.0 }
  0xb2   : > { %v230_v45 = vpop.f32.mrf.mxu0  ;;  %v242_v46 = vpop.f32.mrf.mxu1 }
  0xb3   : > { %299 = vst [vmem:[%s551_s29 + $0x40] sm:$0xff] %v283_v43  ;;  %v231_v47 = vadd.f32 %v430_v32, %v230_v45  ;;  %v243_v48 = vadd.f32 %v430_v32, %v242_v46 }
  0xb4   : > { %303 = vst [vmem:[%s551_s29 + $0x60] sm:$0xff] %v287_v44 }
  0xb5   : > { %v276_v49 = vmax.f32 %v231_v47, 0.0  ;;  %v280_v50 = vmax.f32 %v243_v48, 0.0 }
  0xb6   : > { %v254_v51 = vpop.f32.mrf.mxu2  ;;  %v266_v52 = vpop.f32.mrf.mxu3 }
  0xb7   : > { %292 = vst [vmem:[%s551_s29 + $0x8] sm:$0xff] %v276_v49  ;;  %v255_v53 = vadd.f32 %v430_v32, %v254_v51  ;;  %v267_v54 = vadd.f32 %v430_v32, %v266_v52 }
  0xb8   : > { %296 = vst [vmem:[%s551_s29 + $0x28] sm:$0xff] %v280_v50 }
  0xb9   : > { %v284_v55 = vmax.f32 %v255_v53, 0.0  ;;  %v288_v56 = vmax.f32 %v267_v54, 0.0 }
  0xba   : > { %v233_v57 = vpop.f32.mrf.mxu0  ;;  %v245_v58 = vpop.f32.mrf.mxu1 }
  0xbb   : > { %300 = vst [vmem:[%s551_s29 + $0x48] sm:$0xff] %v284_v55  ;;  %v234_v59 = vadd.f32 %v430_v32, %v233_v57  ;;  %v246_v60 = vadd.f32 %v430_v32, %v245_v58 }
  0xbc   : > { %304 = vst [vmem:[%s551_s29 + $0x68] sm:$0xff] %v288_v56 }
  0xbd   : > { %v277_v61 = vmax.f32 %v234_v59, 0.0  ;;  %v281_v62 = vmax.f32 %v246_v60, 0.0 }
  0xbe   : > { %v257_v63 = vpop.f32.mrf.mxu2  ;;  %v269_v0 = vpop.f32.mrf.mxu3 }
  0xbf   : > { %293 = vst [vmem:[%s551_s29 + $0x10] sm:$0xff] %v277_v61  ;;  %v258_v1 = vadd.f32 %v430_v32, %v257_v63  ;;  %v270_v2 = vadd.f32 %v430_v32, %v269_v0 }
  0xc0   : > { %297 = vst [vmem:[%s551_s29 + $0x30] sm:$0xff] %v281_v62 }
  0xc1   : > { %v285_v3 = vmax.f32 %v258_v1, 0.0  ;;  %v289_v4 = vmax.f32 %v270_v2, 0.0 }
  0xc2   : > { %v236_v5 = vpop.f32.mrf.mxu0  ;;  %v248_v6 = vpop.f32.mrf.mxu1 }
  0xc3   : > { %301 = vst [vmem:[%s551_s29 + $0x50] sm:$0xff] %v285_v3  ;;  %v237_v7 = vadd.f32 %v430_v32, %v236_v5  ;;  %v249_v8 = vadd.f32 %v430_v32, %v248_v6 }
  0xc4   : > { %305 = vst [vmem:[%s551_s29 + $0x70] sm:$0xff] %v289_v4 }
  0xc5   : > { %v278_v9 = vmax.f32 %v237_v7, 0.0  ;;  %v282_v10 = vmax.f32 %v249_v8, 0.0 }
  0xc6   : > { %v260_v11 = vpop.f32.mrf.mxu2  ;;  %v272_v12 = vpop.f32.mrf.mxu3 }
  0xc7   : > { %294 = vst [vmem:[%s551_s29 + $0x18] sm:$0xff] %v278_v9  ;;  %v261_v13 = vadd.f32 %v430_v32, %v260_v11  ;;  %v273_v14 = vadd.f32 %v430_v32, %v272_v12 }
  0xc8   : > { %298 = vst [vmem:[%s551_s29 + $0x38] sm:$0xff] %v282_v10 }
  0xc9   : > { %v286_v15 = vmax.f32 %v261_v13, 0.0  ;;  %v290_v16 = vmax.f32 %v273_v14, 0.0 }
  0xcb   : > { %302 = vst [vmem:[%s551_s29 + $0x58] sm:$0xff] %v286_v15 }
  0xcc   : > { %306 = vst [vmem:[%s551_s29 + $0x78] sm:$0xff] %v290_v16 }
  0xcd PF: > { %s13_s12 = sadd.s32 1, %s437_s12  }
  0xce   : > { %p10_p4 = scmp.ge.s32.totalorder %s13_s12, 6  }
  0xd0   :  { %12 = sbr.rel (!%p10_p4) target bundleno = 1 (0x1), region = 62 }

// kernel: conv_block_forward.3
= control target key start
LH: loop header
LB: loop body
LE: loop exit
PB: predicated region body
PF: predicated region fallthrough
CT: control target
= control target key end

     0   :  { %s1333_s21 = smov 0   ;;  %s2027_s0 = inlined_call_operand.vmem [shape: f32[2,9,9,128], index: 0, kind: input, shape index: {}]   ;;  %s2028_s1 = inlined_call_operand.vmem [shape: f32[2,9,9,128], index: 1, kind: input, shape index: {}]   ;;  %s2029_s2 = inlined_call_operand.vmem [shape: f32[2,9,9,128], index: 2, kind: input, shape index: {}]   ;;  %s2030_s3 = inlined_call_operand.vmem [shape: f32[2,9,9,128], index: 3, kind: input, shape index: {}]   ;;  %s2031_s4 = inlined_call_operand.vmem [shape: f32[9,128,128], index: 4, kind: input, shape index: {}]   ;;  %s2032_s5 = inlined_call_operand.vmem [shape: f32[1,128], index: 5, kind: input, shape index: {}]   ;;  %s2033_s6 = inlined_call_operand.vmem [shape: f32[2,8,8,128], index: 6, kind: output, shape index: {}]  }
   0x1 LB: > { %s1082_s22 = sadd.s32 4294967295, %s1296_s21   ;;  %p1086_p0 = scmp.ge.s32.totalorder %s1296_s21, 1  ;;  %s1296_s21 = sphi %s1333_s21, %s16_s21  }
   0x2   : > { %p242_p1 = scmp.lt.s32.totalorder %s1296_s21, 3 }
   0x4   : > { %p243_p2 = pnand %p1086_p0, %p242_p1 }
   0x5   : > { %p1403_p3 = scmp.lt.s32.totalorder (!%p243_p2), %s1082_s22, 1 }
   0x6   : > { %246 = sbr.rel (%p243_p2) target bundleno = 334 (0x14e), region = 44 }
   0xb   : > { %v1108_v0 = vld [vmem:[%s2031_s4 + $0xf8] sm:$0xff]  ;;  %v1107_v1 = vld [vmem:[%s2031_s4 + $0xf0] sm:$0xff]  ;;  %v1106_v2 = vld [vmem:[%s2031_s4 + $0xe8] sm:$0xff]  ;;  %s2036_s22 = smov (!%p1403_p3, %s1082_s22), 1 }
   0xc   : > { %1248 = vmatpush.msra.mxu1 %v1108_v0  ;;  %361 = vmatpush.msra.mxu0 %v1108_v0  ;;  %v1124_v3 = vld [vmem:[%s2031_s4 + $0x178] sm:$0xff]  ;;  %v1123_v4 = vld [vmem:[%s2031_s4 + $0x170] sm:$0xff]  ;;  %v1105_v5 = vld [vmem:[%s2031_s4 + $0xe0] sm:$0xff]  ;;  %s1450_s20 = smul.u32 144, %s2036_s22 }
   0xd   : > { %468 = vmatpush.msra.mxu2 %v1124_v3  ;;  %v1122_v6 = vld [vmem:[%s2031_s4 + $0x168] sm:$0xff]  ;;  %v1104_v7 = vld [vmem:[%s2031_s4 + $0xd8] sm:$0xff]  ;;  %v1121_v8 = vld [vmem:[%s2031_s4 + $0x160] sm:$0xff] }
   0xe   : > { %1249 = vmatpush.msra.mxu1 %v1107_v1  ;;  %362 = vmatpush.msra.mxu0 %v1107_v1  ;;  %v1103_v9 = vld [vmem:[%s2031_s4 + $0xd0] sm:$0xff]  ;;  %v1140_v10 = vld [vmem:[%s2031_s4 + $0x1f8] sm:$0xff]  ;;  %v1102_v13 = vld [vmem:[%s2031_s4 + $0xc8] sm:$0xff]  ;;  %s1474_s13 = scalar_lea.vmem %s2028_s1, %s1450_s20  ;;  %s1505_s9 = scalar_lea.vmem %s2027_s0, %s1450_s20 }
   0xf   : > { %469 = vmatpush.msra.mxu2 %v1123_v4  ;;  %v1120_v11 = vld [vmem:[%s2031_s4 + $0x158] sm:$0xff]  ;;  %v1139_v12 = vld [vmem:[%s2031_s4 + $0x1f0] sm:$0xff]  ;;  %542 = vmatpush.msra.mxu3 %v1140_v10  ;;  %v1138_v15 = vld [vmem:[%s2031_s4 + $0x1e8] sm:$0xff]  ;;  %s1566_s27 = scalar_lea.vmem %s2029_s2, %s1450_s20  ;;  %s1682_s8 = scalar_lea.vmem %s2030_s3, %s1450_s20 }
  0x10   : > { %1250 = vmatpush.msra.mxu1 %v1106_v2  ;;  %363 = vmatpush.msra.mxu0 %v1106_v2  ;;  %v1119_v14 = vld [vmem:[%s2031_s4 + $0x150] sm:$0xff]  ;;  %v1101_v16 = vld [vmem:[%s2031_s4 + $0xc0] sm:$0xff]  ;;  %v1118_v17 = vld [vmem:[%s2031_s4 + $0x148] sm:$0xff] }
  0x11   : > { %470 = vmatpush.msra.mxu2 %v1122_v6  ;;  %543 = vmatpush.msra.mxu3 %v1139_v12  ;;  %v1137_v18 = vld [vmem:[%s2031_s4 + $0x1e0] sm:$0xff]  ;;  %v1100_v19 = vld [vmem:[%s2031_s4 + $0xb8] sm:$0xff]  ;;  %v1099_v22 = vld [vmem:[%s2031_s4 + $0xb0] sm:$0xff] }
  0x12   : > { %1251 = vmatpush.msra.mxu1 %v1105_v5  ;;  %364 = vmatpush.msra.mxu0 %v1105_v5  ;;  %v1117_v20 = vld [vmem:[%s2031_s4 + $0x140] sm:$0xff]  ;;  %v1136_v21 = vld [vmem:[%s2031_s4 + $0x1d8] sm:$0xff]  ;;  %v1135_v24 = vld [vmem:[%s2031_s4 + $0x1d0] sm:$0xff] }
  0x13   : > { %471 = vmatpush.msra.mxu2 %v1121_v8  ;;  %544 = vmatpush.msra.mxu3 %v1138_v15  ;;  %v1116_v23 = vld [vmem:[%s2031_s4 + $0x138] sm:$0xff]  ;;  %v1098_v25 = vld [vmem:[%s2031_s4 + $0xa8] sm:$0xff]  ;;  %v1115_v26 = vld [vmem:[%s2031_s4 + $0x130] sm:$0xff] }
  0x14   : > { %1252 = vmatpush.msra.mxu1 %v1104_v7  ;;  %365 = vmatpush.msra.mxu0 %v1104_v7  ;;  %v1134_v27 = vld [vmem:[%s2031_s4 + $0x1c8] sm:$0xff]  ;;  %v1097_v28 = vld [vmem:[%s2031_s4 + $0xa0] sm:$0xff]  ;;  %v1096_v31 = vld [vmem:[%s2031_s4 + $0x98] sm:$0xff] }
  0x15   : > { %472 = vmatpush.msra.mxu2 %v1120_v11  ;;  %545 = vmatpush.msra.mxu3 %v1137_v18  ;;  %v1114_v29 = vld [vmem:[%s2031_s4 + $0x128] sm:$0xff]  ;;  %v1133_v30 = vld [vmem:[%s2031_s4 + $0x1c0] sm:$0xff]  ;;  %v1132_v33 = vld [vmem:[%s2031_s4 + $0x1b8] sm:$0xff] }
  0x16   : > { %1253 = vmatpush.msra.mxu1 %v1103_v9  ;;  %366 = vmatpush.msra.mxu0 %v1103_v9  ;;  %v1113_v32 = vld [vmem:[%s2031_s4 + $0x120] sm:$0xff]  ;;  %v1095_v34 = vld [vmem:[%s2031_s4 + $0x90] sm:$0xff]  ;;  %v1112_v35 = vld [vmem:[%s2031_s4 + $0x118] sm:$0xff] }
  0x17   : > { %473 = vmatpush.msra.mxu2 %v1119_v14  ;;  %546 = vmatpush.msra.mxu3 %v1136_v21  ;;  %v1131_v36 = vld [vmem:[%s2031_s4 + $0x1b0] sm:$0xff]  ;;  %v1094_v37 = vld [vmem:[%s2031_s4 + $0x88] sm:$0xff]  ;;  %v1093_v40 = vld [vmem:[%s2031_s4 + $0x80] sm:$0xff] }
  0x18   : > { %1254 = vmatpush.msra.mxu1 %v1102_v13  ;;  %367 = vmatpush.msra.mxu0 %v1102_v13  ;;  %v1111_v38 = vld [vmem:[%s2031_s4 + $0x110] sm:$0xff]  ;;  %v1130_v39 = vld [vmem:[%s2031_s4 + $0x1a8] sm:$0xff]  ;;  %v1486_v41 = vld [vmem:[%s1474_s13 + $0x40] sm:$0xff] }
  0x19   : > { %474 = vmatpush.msra.mxu2 %v1118_v17  ;;  %547 = vmatpush.msra.mxu3 %v1135_v24  ;;  %v336_v42 = vld [vmem:[%s1474_s13] sm:$0xff]  ;;  %v335_v43 = vld [vmem:[%s2031_s4 + $0x78] sm:$0xff]  ;;  %v1110_v45 = vld [vmem:[%s2031_s4 + $0x108] sm:$0xff] }
  0x1a   : > { %1255 = vmatpush.msra.mxu1 %v1101_v16  ;;  %368 = vmatpush.msra.mxu0 %v1101_v16  ;;  %v1156_v44 = vld [vmem:[%s2031_s4 + $0x278] sm:$0xff]  ;;  %v1129_v46 = vld [vmem:[%s2031_s4 + $0x1a0] sm:$0xff]  ;;  %v334_v47 = vld [vmem:[%s2031_s4 + $0x70] sm:$0xff] }
  0x1b   : > { %475 = vmatpush.msra.mxu2 %v1117_v20  ;;  %548 = vmatpush.msra.mxu3 %v1134_v27  ;;  %v1155_v48 = vld [vmem:[%s2031_s4 + $0x270] sm:$0xff]  ;;  %v1109_v49 = vld [vmem:[%s2031_s4 + $0x100] sm:$0xff]  ;;  %v1128_v50 = vld [vmem:[%s2031_s4 + $0x198] sm:$0xff] }
  0x1c   : > { %1256 = vmatpush.msra.mxu1 %v1100_v19  ;;  %369 = vmatpush.msra.mxu0 %v1100_v19  ;;  %v333_v51 = vld [vmem:[%s2031_s4 + $0x68] sm:$0xff]  ;;  %v1127_v54 = vld [vmem:[%s2031_s4 + $0x190] sm:$0xff]  ;;  %v332_v55 = vld [vmem:[%s2031_s4 + $0x60] sm:$0xff] }
  0x1d   : > { %476 = vmatpush.msra.mxu2 %v1116_v23  ;;  %549 = vmatpush.msra.mxu3 %v1133_v30  ;;  %v1154_v52 = vld [vmem:[%s2031_s4 + $0x268] sm:$0xff]  ;;  %v1153_v56 = vld [vmem:[%s2031_s4 + $0x260] sm:$0xff]  ;;  %v1537_v57 = vld [vmem:[%s1474_s13 + $0x50] sm:$0xff] }
  0x1e   : > { %1257 = vmatpush.msra.mxu1 %v1099_v22  ;;  %370 = vmatpush.msra.mxu0 %v1099_v22  ;;  %v443_v53 = vld [vmem:[%s1505_s9 + $0x1] sm:$0xff]  ;;  %v1540_v58 = vld [vmem:[%s1474_s13 + $0x10] sm:$0xff]  ;;  %v331_v59 = vld [vmem:[%s2031_s4 + $0x58] sm:$0xff] }
  0x1f   : > { %477 = vmatpush.msra.mxu2 %v1115_v26  ;;  %550 = vmatpush.msra.mxu3 %v1132_v33  ;;  %v1152_v60 = vld [vmem:[%s2031_s4 + $0x258] sm:$0xff]  ;;  %v1126_v62 = vld [vmem:[%s2031_s4 + $0x188] sm:$0xff]  ;;  %v330_v63 = vld [vmem:[%s2031_s4 + $0x50] sm:$0xff] }
  0x20   : > { %1258 = vmatpush.msra.mxu1 %v1098_v25  ;;  %371 = vmatpush.msra.mxu0 %v1098_v25  ;;  %v1196_v61 = vld [vmem:[%s2031_s4 + $0x378] sm:$0xff]  ;;  %v1151_v0 = vld [vmem:[%s2031_s4 + $0x250] sm:$0xff]  ;;  %v1125_v2 = vld [vmem:[%s2031_s4 + $0x180] sm:$0xff] }
  0x21   : > { %478 = vmatpush.msra.mxu2 %v1114_v29  ;;  %551 = vmatpush.msra.mxu3 %v1131_v36  ;;  %v1195_v1 = vld [vmem:[%s2031_s4 + $0x370] sm:$0xff]  ;;  %v329_v3 = vld [vmem:[%s2031_s4 + $0x48] sm:$0xff]  ;;  %v517_v6 = vld [vmem:[%s1566_s27] sm:$0xff] }
  0x22   : > { %1259 = vmatpush.msra.mxu1 %v1097_v28  ;;  %372 = vmatpush.msra.mxu0 %v1097_v28  ;;  %v1150_v4 = vld [vmem:[%s2031_s4 + $0x248] sm:$0xff]  ;;  %v1581_v5 = vld [vmem:[%s1505_s9 + $0x11] sm:$0xff]  ;;  %v328_v7 = vld [vmem:[%s2031_s4 + $0x40] sm:$0xff] }
  0x23   : > { %479 = vmatpush.msra.mxu2 %v1113_v32  ;;  %552 = vmatpush.msra.mxu3 %v1130_v39  ;;  %v1149_v8 = vld [vmem:[%s2031_s4 + $0x240] sm:$0xff]  ;;  %v327_v11 = vld [vmem:[%s2031_s4 + $0x38] sm:$0xff]  ;;  %v1194_v13 = vld [vmem:[%s2031_s4 + $0x368] sm:$0xff] }
  0x24   : > { %1260 = vmatpush.msra.mxu1 %v1096_v31  ;;  %373 = vmatpush.msra.mxu0 %v1096_v31  ;;  %v1591_v9 = vld [vmem:[%s1474_s13 + $0x60] sm:$0xff]  ;;  %v1148_v12 = vld [vmem:[%s2031_s4 + $0x238] sm:$0xff]  ;;  %v326_v15 = vld [vmem:[%s2031_s4 + $0x30] sm:$0xff] }
  0x25   : > { %480 = vmatpush.msra.mxu2 %v1112_v35  ;;  %553 = vmatpush.msra.mxu3 %v1129_v46  ;;  %v1594_v10 = vld [vmem:[%s1474_s13 + $0x20] sm:$0xff]  ;;  %v1220_v14 = vld [vmem:[%s2031_s4 + $0x3f8] sm:$0xff]  ;;  %v1147_v16 = vld [vmem:[%s2031_s4 + $0x230] sm:$0xff] }
  0x26   : > { %1261 = vmatpush.msra.mxu1 %v1095_v34  ;;  %374 = vmatpush.msra.mxu0 %v1095_v34  ;;  %v1193_v17 = vld [vmem:[%s2031_s4 + $0x360] sm:$0xff]  ;;  %v1219_v18 = vld [vmem:[%s2031_s4 + $0x3f0] sm:$0xff]  ;;  %v325_v19 = vld [vmem:[%s2031_s4 + $0x28] sm:$0xff] }
  0x27   : > { %481 = vmatpush.msra.mxu2 %v1111_v38  ;;  %554 = vmatpush.msra.mxu3 %v1128_v50  ;;  %v1146_v20 = vld [vmem:[%s2031_s4 + $0x228] sm:$0xff]  ;;  %v518_v22 = vld [vmem:[%s1566_s27 + $0x10] sm:$0xff]  ;;  %v324_v23 = vld [vmem:[%s2031_s4 + $0x20] sm:$0xff] }
  0x28   : > { %1262 = vmatpush.msra.mxu1 %v1094_v37  ;;  %375 = vmatpush.msra.mxu0 %v1094_v37  ;;  %v1630_v21 = vld [vmem:[%s1505_s9 + $0x21] sm:$0xff]  ;;  %v1640_v25 = vld [vmem:[%s1474_s13 + $0x70] sm:$0xff]  ;;  %v323_v27 = vld [vmem:[%s2031_s4 + $0x18] sm:$0xff] }
  0x29   : > { %482 = vmatpush.msra.mxu2 %v1110_v45  ;;  %555 = vmatpush.msra.mxu3 %v1127_v54  ;;  %v1145_v24 = vld [vmem:[%s2031_s4 + $0x220] sm:$0xff]  ;;  %v1643_v26 = vld [vmem:[%s1474_s13 + $0x30] sm:$0xff]  ;;  %v1144_v28 = vld [vmem:[%s2031_s4 + $0x218] sm:$0xff] }
  0x2a   : > { %1263 = vmatpush.msra.mxu1 %v1093_v40  ;;  %376 = vmatpush.msra.mxu0 %v1093_v40  ;;  %v1192_v29 = vld [vmem:[%s2031_s4 + $0x358] sm:$0xff]  ;;  %v1218_v30 = vld [vmem:[%s2031_s4 + $0x3e8] sm:$0xff]  ;;  %v322_v31 = vld [vmem:[%s2031_s4 + $0x10] sm:$0xff] }
  0x2b   : > { %389 = vmatmul.f32.vlgmr.msra.gmra.mxu1 %v1486_v41  ;;  %377 = vmatmul.f32.vlgmr.msra.gmra.mxu0 %v336_v42  ;;  %v1143_v32 = vld [vmem:[%s2031_s4 + $0x210] sm:$0xff]  ;;  %v1217_v34 = vld [vmem:[%s2031_s4 + $0x3e0] sm:$0xff]  ;;  %v321_v35 = vld [vmem:[%s2031_s4 + $0x8] sm:$0xff] }
  0x2c   : > { %402 = vmatpush.msrb.mxu1 %v335_v43  ;;  %616 = vmatpush.msrb.mxu0 %v1156_v44  ;;  %v1191_v33 = vld [vmem:[%s2031_s4 + $0x350] sm:$0xff]  ;;  %v1142_v36 = vld [vmem:[%s2031_s4 + $0x208] sm:$0xff]  ;;  %v519_v38 = vld [vmem:[%s1566_s27 + $0x20] sm:$0xff] }
  0x2d   : > { %483 = vmatpush.msra.mxu2 %v1109_v49  ;;  %556 = vmatpush.msra.mxu3 %v1126_v62  ;;  %v1685_v37 = vld [vmem:[%s1505_s9 + $0x31] sm:$0xff]  ;;  %v320_v39 = vld [vmem:[%s2031_s4] sm:$0xff]  ;;  %v1190_v45 = vld [vmem:[%s2031_s4 + $0x348] sm:$0xff] }
  0x2e   : > { %403 = vmatpush.msrb.mxu1 %v334_v47  ;;  %617 = vmatpush.msrb.mxu0 %v1155_v48  ;;  %v1141_v40 = vld [vmem:[%s2031_s4 + $0x200] sm:$0xff]  ;;  %v1172_v44 = vld [vmem:[%s2031_s4 + $0x2f8] sm:$0xff]  ;;  %v1171_v48 = vld [vmem:[%s2031_s4 + $0x2f0] sm:$0xff] }
  0x2f   : > { %484 = vmatmul.f32.vlgmr.msra.gmra.mxu2 %v443_v53  ;;  %557 = vmatpush.msra.mxu3 %v1125_v2  ;;  %v312_v42 = vld [vmem:[%s1505_s9] sm:$0xff]  ;;  %v1216_v46 = vld [vmem:[%s2031_s4 + $0x3d8] sm:$0xff]  ;;  %v1215_v50 = vld [vmem:[%s2031_s4 + $0x3d0] sm:$0xff] }
  0x30   : > { %404 = vmatpush.msrb.mxu1 %v333_v51  ;;  %618 = vmatpush.msrb.mxu0 %v1154_v52  ;;  %v591_v43 = vld [vmem:[%s1682_s8] sm:$0xff]  ;;  %v1709_v47 = vld [vmem:[%s2031_s4 + $0x478] sm:$0xff]  ;;  %v1723_v51 = vld [vmem:[%s2031_s4 + $0x470] sm:$0xff] }
  0x31   : > { %765 = vmatpush.msrb.mxu2 %v1196_v61  ;;  %558 = vmatmul.f32.vlgmr.msra.gmra.mxu3 %v517_v6  ;;  %v1189_v49 = vld [vmem:[%s2031_s4 + $0x340] sm:$0xff]  ;;  %v1170_v52 = vld [vmem:[%s2031_s4 + $0x2e8] sm:$0xff]  ;;  %v1188_v53 = vld [vmem:[%s2031_s4 + $0x338] sm:$0xff] }
  0x32   : > { %405 = vmatpush.msrb.mxu1 %v332_v55  ;;  %619 = vmatpush.msrb.mxu0 %v1153_v56  ;;  %v1733_v54 = vld [vmem:[%s1505_s9 + $0x41] sm:$0xff]  ;;  %v520_v55 = vld [vmem:[%s1566_s27 + $0x30] sm:$0xff]  ;;  %v1168_v62 = vld [vmem:[%s2031_s4 + $0x2d8] sm:$0xff] }
  0x33   : > { %392 = vmatmul.f32.gmra.mxu1 %v1537_v57  ;;  %380 = vmatmul.f32.gmra.mxu0 %v1540_v58  ;;  %v1169_v56 = vld [vmem:[%s2031_s4 + $0x2e0] sm:$0xff]  ;;  %v592_v61 = vld [vmem:[%s1682_s8 + $0x10] sm:$0xff] }
  0x34   : > { %406 = vmatpush.msrb.mxu1 %v331_v59  ;;  %620 = vmatpush.msrb.mxu0 %v1152_v60  ;;  %v1187_v59 = vld [vmem:[%s2031_s4 + $0x330] sm:$0xff]  ;;  %v1775_v6 = vld [vmem:[%s2031_s4 + $0x460] sm:$0xff] }
  0x35   : > { %766 = vmatpush.msrb.mxu2 %v1195_v1  ;;  %840 = vmatpush.msrb.mxu3 %v1220_v14  ;;  %v1744_v60 = vld [vmem:[%s1505_s9 + $0x10] sm:$0xff]  ;;  %v1760_v1 = vld [vmem:[%s2031_s4 + $0x468] sm:$0xff]  ;;  %v1184_v14 = vld [vmem:[%s2031_s4 + $0x318] sm:$0xff] }
  0x36   : > { %407 = vmatpush.msrb.mxu1 %v330_v63  ;;  %621 = vmatpush.msrb.mxu0 %v1151_v0  ;;  %v1214_v63 = vld [vmem:[%s2031_s4 + $0x3c8] sm:$0xff]  ;;  %v1167_v2 = vld [vmem:[%s2031_s4 + $0x2d0] sm:$0xff] }
  0x37   : > { %487 = vmatmul.f32.gmra.mxu2 %v1581_v5  ;;  %841 = vmatpush.msrb.mxu3 %v1219_v18  ;;  %v1186_v0 = vld [vmem:[%s2031_s4 + $0x328] sm:$0xff]  ;;  %v1211_v18 = vld [vmem:[%s2031_s4 + $0x3b0] sm:$0xff] }
  0x38   : > { %408 = vmatpush.msrb.mxu1 %v329_v3  ;;  %622 = vmatpush.msrb.mxu0 %v1150_v4  ;;  %v1213_v3 = vld [vmem:[%s2031_s4 + $0x3c0] sm:$0xff] }
  0x39   : > { %767 = vmatpush.msrb.mxu2 %v1194_v13  ;;  %561 = vmatmul.f32.gmra.mxu3 %v518_v22  ;;  %v1185_v4 = vld [vmem:[%s2031_s4 + $0x320] sm:$0xff]  ;;  %v1163_v22 = vld [vmem:[%s2031_s4 + $0x2b0] sm:$0xff] }
  0x3a   : > { %409 = vmatpush.msrb.mxu1 %v328_v7  ;;  %623 = vmatpush.msrb.mxu0 %v1149_v8  ;;  %v1166_v7 = vld [vmem:[%s2031_s4 + $0x2c8] sm:$0xff]  ;;  %v1212_v8 = vld [vmem:[%s2031_s4 + $0x3b8] sm:$0xff]  ;;  %v1165_v13 = vld [vmem:[%s2031_s4 + $0x2c0] sm:$0xff] }
  0x3b   : > { %395 = vmatmul.f32.gmra.mxu1 %v1591_v9  ;;  %383 = vmatmul.f32.gmra.mxu0 %v1594_v10 }
  0x3c   : > { %410 = vmatpush.msrb.mxu1 %v327_v11  ;;  %624 = vmatpush.msrb.mxu0 %v1148_v12  ;;  %v1785_v11 = vld [vmem:[%s1505_s9 + $0x51] sm:$0xff]  ;;  %v521_v12 = vld [vmem:[%s1566_s27 + $0x40] sm:$0xff] }
  0x3d   : > { %768 = vmatpush.msrb.mxu2 %v1193_v17  ;;  %842 = vmatpush.msrb.mxu3 %v1218_v30  ;;  %v1164_v17 = vld [vmem:[%s2031_s4 + $0x2b8] sm:$0xff]  ;;  %v1837_v30 = vld [vmem:[%s1505_s9 + $0x61] sm:$0xff] }
  0x3e   : > { %411 = vmatpush.msrb.mxu1 %v326_v15  ;;  %625 = vmatpush.msrb.mxu0 %v1147_v16  ;;  %v1796_v15 = vld [vmem:[%s1505_s9 + $0x20] sm:$0xff] }
  0x3f   : > { %490 = vmatmul.f32.gmra.mxu2 %v1630_v21  ;;  %843 = vmatpush.msrb.mxu3 %v1217_v34  ;;  %v593_v16 = vld [vmem:[%s1682_s8 + $0x20] sm:$0xff]  ;;  %v1848_v34 = vld [vmem:[%s1505_s9 + $0x30] sm:$0xff] }
  0x40   : > { %412 = vmatpush.msrb.mxu1 %v325_v19  ;;  %626 = vmatpush.msrb.mxu0 %v1146_v20  ;;  %v1183_v19 = vld [vmem:[%s2031_s4 + $0x310] sm:$0xff]  ;;  %v1812_v20 = vld [vmem:[%s2031_s4 + $0x458] sm:$0xff] }
  0x41   : > { %769 = vmatpush.msrb.mxu2 %v1192_v29  ;;  %564 = vmatmul.f32.gmra.mxu3 %v519_v38  ;;  %v1209_v29 = vld [vmem:[%s2031_s4 + $0x3a0] sm:$0xff]  ;;  %v1238_v38 = vld [vmem:[%s2031_s4 + $0x448] sm:$0xff] }
  0x42   : > { %413 = vmatpush.msrb.mxu1 %v324_v23  ;;  %627 = vmatpush.msrb.mxu0 %v1145_v24  ;;  %v1210_v23 = vld [vmem:[%s2031_s4 + $0x3a8] sm:$0xff] }
  0x43   : > { %398 = vmatmul.f32.gmra.mxu1 %v1640_v25  ;;  %386 = vmatmul.f32.gmra.mxu0 %v1643_v26  ;;  %v1182_v24 = vld [vmem:[%s2031_s4 + $0x308] sm:$0xff] }
  0x44   : > { %414 = vmatpush.msrb.mxu1 %v323_v27  ;;  %628 = vmatpush.msrb.mxu0 %v1144_v28  ;;  %v1827_v27 = vld [vmem:[%s2031_s4 + $0x450] sm:$0xff]  ;;  %v1162_v28 = vld [vmem:[%s2031_s4 + $0x2a8] sm:$0xff] }
  0x45   : > { %770 = vmatpush.msrb.mxu2 %v1191_v33  ;;  %844 = vmatpush.msrb.mxu3 %v1216_v46  ;;  %v1181_v33 = vld [vmem:[%s2031_s4 + $0x300] sm:$0xff]  ;;  %v1879_v46 = vld [vmem:[%s1505_s9 + $0x71] sm:$0xff] }
  0x46   : > { %415 = vmatpush.msrb.mxu1 %v322_v31  ;;  %629 = vmatpush.msrb.mxu0 %v1143_v32  ;;  %v522_v31 = vld [vmem:[%s1566_s27 + $0x50] sm:$0xff]  ;;  %v1161_v32 = vld [vmem:[%s2031_s4 + $0x2a0] sm:$0xff] }
  0x47   : > { %493 = vmatmul.f32.gmra.mxu2 %v1685_v37  ;;  %845 = vmatpush.msrb.mxu3 %v1215_v50  ;;  %v595_v50 = vld [vmem:[%s1682_s8 + $0x40] sm:$0xff] }
  0x48   : > { %416 = vmatpush.msrb.mxu1 %v321_v35  ;;  %630 = vmatpush.msrb.mxu0 %v1142_v36  ;;  %v594_v35 = vld [vmem:[%s1682_s8 + $0x30] sm:$0xff]  ;;  %v1208_v36 = vld [vmem:[%s2031_s4 + $0x398] sm:$0xff] }
  0x49   : > { %771 = vmatpush.msrb.mxu2 %v1190_v45  ;;  %567 = vmatmul.f32.gmra.mxu3 %v520_v55  ;;  %v1236_v45 = vld [vmem:[%s2031_s4 + $0x438] sm:$0xff]  ;;  %v1234_v55 = vld [vmem:[%s2031_s4 + $0x428] sm:$0xff] }
  0x4a   : > { %417 = vmatpush.msrb.mxu1 %v320_v39  ;;  %631 = vmatpush.msrb.mxu0 %v1141_v40  ;;  %v1160_v39 = vld [vmem:[%s2031_s4 + $0x298] sm:$0xff]  ;;  %v1207_v40 = vld [vmem:[%s2031_s4 + $0x390] sm:$0xff] }
  0x4b   : > { %418 = vmatmul.f32.vlgmr.msrb.gmra.mxu1 %v312_v42  ;;  %632 = vmatmul.f32.vlgmr.msrb.gmra.mxu0 %v591_v43  ;;  %v1237_v42 = vld [vmem:[%s2031_s4 + $0x440] sm:$0xff]  ;;  %v1159_v43 = vld [vmem:[%s2031_s4 + $0x290] sm:$0xff] }
  0x4c   : > { %690 = vmatpush.msra.mxu1 %v1172_v44  ;;  %914 = vmatpush.msra.mxu0 %v1709_v47  ;;  %v1206_v44 = vld [vmem:[%s2031_s4 + $0x388] sm:$0xff] }
  0x4d   : > { %772 = vmatpush.msrb.mxu2 %v1189_v49  ;;  %846 = vmatpush.msrb.mxu3 %v1214_v63  ;;  %v316_v49 = vld [vmem:[%s1505_s9 + $0x40] sm:$0xff]  ;;  %v596_v63 = vld [vmem:[%s1682_s8 + $0x50] sm:$0xff] }
  0x4e   : > { %691 = vmatpush.msra.mxu1 %v1171_v48  ;;  %915 = vmatpush.msra.mxu0 %v1723_v51  ;;  %v523_v48 = vld [vmem:[%s1566_s27 + $0x60] sm:$0xff] }
  0x4f   : > { %773 = vmatpush.msrb.mxu2 %v1188_v53  ;;  %847 = vmatpush.msrb.mxu3 %v1213_v3  ;;  %v1157_v53 = vld [vmem:[%s2031_s4 + $0x280] sm:$0xff] }
  0x50   : > { %692 = vmatpush.msra.mxu1 %v1170_v52  ;;  %496 = vmatmul.f32.gmra.mxu2 %v1733_v54  ;;  %v1235_v52 = vld [vmem:[%s2031_s4 + $0x430] sm:$0xff]  ;;  %v597_v3 = vld [vmem:[%s1682_s8 + $0x60] sm:$0xff] }
  0x51   : > { %774 = vmatpush.msrb.mxu2 %v1187_v59  ;;  %916 = vmatpush.msra.mxu0 %v1760_v1  ;;  %v524_v59 = vld [vmem:[%s1566_s27 + $0x70] sm:$0xff] }
  0x52   : > { %693 = vmatpush.msra.mxu1 %v1169_v56  ;;  %848 = vmatpush.msrb.mxu3 %v1212_v8  ;;  %v1233_v56 = vld [vmem:[%s2031_s4 + $0x420] sm:$0xff] }
  0x53   : > { %421 = vmatmul.f32.gmra.mxu1 %v1744_v60  ;;  %635 = vmatmul.f32.gmra.mxu0 %v592_v61  ;;  %v1232_v61 = vld [vmem:[%s2031_s4 + $0x418] sm:$0xff] }
  0x54   : > { %694 = vmatpush.msra.mxu1 %v1168_v62  ;;  %775 = vmatpush.msrb.mxu2 %v1186_v0  ;;  %v317_v62 = vld [vmem:[%s1505_s9 + $0x50] sm:$0xff] }
  0x55   : > { %917 = vmatpush.msra.mxu0 %v1775_v6  ;;  %570 = vmatmul.f32.gmra.mxu3 %v521_v12  ;;  %v1231_v0 = vld [vmem:[%s2031_s4 + $0x410] sm:$0xff] }
  0x56   : > { %695 = vmatpush.msra.mxu1 %v1167_v2  ;;  %776 = vmatpush.msrb.mxu2 %v1185_v4  ;;  %v318_v2 = vld [vmem:[%s1505_s9 + $0x60] sm:$0xff]  ;;  %v319_v4 = vld [vmem:[%s1505_s9 + $0x70] sm:$0xff] }
  0x57   : > { %849 = vmatpush.msrb.mxu3 %v1211_v18  ;;  %918 = vmatpush.msra.mxu0 %v1812_v20  ;;  %v670_v12 = vld [vmem:[%s1566_s27 + $0x51] sm:$0xff] }
  0x58   : > { %696 = vmatpush.msra.mxu1 %v1166_v7  ;;  %499 = vmatmul.f32.gmra.mxu2 %v1785_v11  ;;  %v666_v7 = vld [vmem:[%s1566_s27 + $0x11] sm:$0xff] }
  0x59   : > { %777 = vmatpush.msrb.mxu2 %v1184_v14  ;;  %850 = vmatpush.msrb.mxu3 %v1210_v23  ;;  %v672_v18 = vld [vmem:[%s1566_s27 + $0x71] sm:$0xff] }
  0x5a   : > { %697 = vmatpush.msra.mxu1 %v1165_v13  ;;  %919 = vmatpush.msra.mxu0 %v1827_v27  ;;  %v1228_v13 = vld [vmem:[%s1505_s9 + $0x81] sm:$0xff] }
  0x5b   : > { %424 = vmatmul.f32.gmra.mxu1 %v1796_v15  ;;  %638 = vmatmul.f32.gmra.mxu0 %v593_v16 }
  0x5c   : > { %698 = vmatpush.msra.mxu1 %v1164_v17  ;;  %778 = vmatpush.msrb.mxu2 %v1183_v19 }
  0x5d   : > { %851 = vmatpush.msrb.mxu3 %v1209_v29  ;;  %920 = vmatpush.msra.mxu0 %v1238_v38 }
  0x5e   : > { %699 = vmatpush.msra.mxu1 %v1163_v22  ;;  %779 = vmatpush.msrb.mxu2 %v1182_v24 }
  0x5f   : > { %573 = vmatmul.f32.gmra.mxu3 %v522_v31  ;;  %921 = vmatpush.msra.mxu0 %v1237_v42 }
  0x60   : > { %700 = vmatpush.msra.mxu1 %v1162_v28  ;;  %502 = vmatmul.f32.gmra.mxu2 %v1837_v30 }
  0x61   : > { %780 = vmatpush.msrb.mxu2 %v1181_v33  ;;  %852 = vmatpush.msrb.mxu3 %v1208_v36 }
  0x62   : > { %701 = vmatpush.msra.mxu1 %v1161_v32  ;;  %922 = vmatpush.msra.mxu0 %v1236_v45 }
  0x63   : > { %427 = vmatmul.f32.gmra.mxu1 %v1848_v34  ;;  %641 = vmatmul.f32.gmra.mxu0 %v594_v35 }
  0x64   : > { %702 = vmatpush.msra.mxu1 %v1160_v39  ;;  %1264 = vmatpush.msra.mxu2 %v1709_v47  ;;  %v1158_v47 = vld [vmem:[%s2031_s4 + $0x288] sm:$0xff] }
  0x65   : > { %853 = vmatpush.msrb.mxu3 %v1207_v40  ;;  %923 = vmatpush.msra.mxu0 %v1235_v52 }
  0x66   : > { %703 = vmatpush.msra.mxu1 %v1159_v43  ;;  %1265 = vmatpush.msra.mxu2 %v1723_v51  ;;  %v1205_v51 = vld [vmem:[%s2031_s4 + $0x380] sm:$0xff] }
  0x67   : > { %854 = vmatpush.msrb.mxu3 %v1206_v44  ;;  %924 = vmatpush.msra.mxu0 %v1234_v55 }
  0x68   : > { %505 = vmatmul.f32.gmra.mxu2 %v1879_v46  ;;  %576 = vmatmul.f32.gmra.mxu3 %v523_v48 }
  0x69   : > { %704 = vmatpush.msra.mxu1 %v1158_v47  ;;  %1266 = vmatpush.msra.mxu2 %v1760_v1  ;;  %v1230_v1 = vld [vmem:[%s2031_s4 + $0x408] sm:$0xff] }
  0x6a   : > { %855 = vmatpush.msrb.mxu3 %v1205_v51  ;;  %925 = vmatpush.msra.mxu0 %v1233_v56 }
  0x6b   : > { %430 = vmatmul.f32.gmra.mxu1 %v316_v49  ;;  %644 = vmatmul.f32.gmra.mxu0 %v595_v50 }
  0x6c   : > { %705 = vmatpush.msra.mxu1 %v1157_v53  ;;  %1267 = vmatpush.msra.mxu2 %v1775_v6  ;;  %v598_v6 = vld [vmem:[%s1682_s8 + $0x70] sm:$0xff] }
  0x6d   : > { %926 = vmatpush.msra.mxu0 %v1232_v61 }
  0x6e   : > { %1268 = vmatpush.msra.mxu2 %v1812_v20 }
  0x6f   : > { %927 = vmatpush.msra.mxu0 %v1231_v0 }
  0x70   : > { %781 = vmatmul.f32.vlgmr.msrb.gmra.mxu2 %v1744_v60  ;;  %579 = vmatmul.f32.gmra.mxu3 %v524_v59  ;;  %v1229_v60 = vld [vmem:[%s2031_s4 + $0x400] sm:$0xff] }
  0x71   : > { %1269 = vmatpush.msra.mxu2 %v1827_v27  ;;  %928 = vmatpush.msra.mxu0 %v1230_v1 }
  0x73   : > { %433 = vmatmul.f32.gmra.mxu1 %v317_v62  ;;  %647 = vmatmul.f32.gmra.mxu0 %v596_v63 }
  0x74   : > { %1270 = vmatpush.msra.mxu2 %v1238_v38  ;;  %929 = vmatpush.msra.mxu0 %v1229_v60 }
  0x76   : > { %1271 = vmatpush.msra.mxu2 %v1237_v42 }
  0x78   : > { %1272 = vmatpush.msra.mxu2 %v1236_v45  ;;  %856 = vmatmul.f32.vlgmr.msrb.gmra.mxu3 %v1540_v58  ;;  %v665_v58 = vld [vmem:[%s1566_s27 + $0x1] sm:$0xff] }
  0x79   : > { %784 = vmatmul.f32.gmra.mxu2 %v1796_v15  ;;  %v671_v15 = vld [vmem:[%s1566_s27 + $0x61] sm:$0xff] }
  0x7a   : > { %1273 = vmatpush.msra.mxu2 %v1235_v52 }
  0x7b   : > { %436 = vmatmul.f32.gmra.mxu1 %v318_v2  ;;  %650 = vmatmul.f32.gmra.mxu0 %v597_v3 }
  0x7c   : > { %1274 = vmatpush.msra.mxu2 %v1234_v55 }
  0x7e   : > { %1275 = vmatpush.msra.mxu2 %v1233_v56 }
  0x80   : > { %1276 = vmatpush.msra.mxu2 %v1232_v61  ;;  %859 = vmatmul.f32.gmra.mxu3 %v1594_v10  ;;  %v667_v10 = vld [vmem:[%s1566_s27 + $0x21] sm:$0xff] }
  0x81   : > { %787 = vmatmul.f32.gmra.mxu2 %v1848_v34 }
  0x82   : > { %1277 = vmatpush.msra.mxu2 %v1231_v0 }
  0x83   : > { %439 = vmatmul.f32.gmra.mxu1 %v319_v4  ;;  %653 = vmatmul.f32.gmra.mxu0 %v598_v6 }
  0x84   : > { %1278 = vmatpush.msra.mxu2 %v1230_v1 }
  0x86   : > { %1279 = vmatpush.msra.mxu2 %v1229_v60 }
  0x88   : > { %862 = vmatmul.f32.gmra.mxu3 %v1643_v26  ;;  %v668_v26 = vld [vmem:[%s1566_s27 + $0x31] sm:$0xff] }
  0x89   : > { %790 = vmatmul.f32.gmra.mxu2 %v316_v49 }
  0x8b   : > { %706 = vmatmul.f32.vlgmr.msra.gmra.mxu1 %v665_v58  ;;  %930 = vmatmul.f32.vlgmr.msra.gmra.mxu0 %v1581_v5 }
  0x90   : > { %865 = vmatmul.f32.gmra.mxu3 %v1486_v41  ;;  %v1180_v41 = vld [vmem:[%s1505_s9 + $0x80] sm:$0xff] }
  0x91   : > { %793 = vmatmul.f32.gmra.mxu2 %v317_v62 }
  0x93   : > { %709 = vmatmul.f32.gmra.mxu1 %v666_v7  ;;  %933 = vmatmul.f32.gmra.mxu0 %v1630_v21  ;;  %v669_v21 = vld [vmem:[%s1566_s27 + $0x41] sm:$0xff]  ;;  %s1247_s27 = sshll.u32 %s2036_s22, 6 }
  0x94   : > { %s1993_s15 = scalar_lea.vmem %s2033_s6, %s1247_s27 }
  0x98   : > { %868 = vmatmul.f32.gmra.mxu3 %v1537_v57  ;;  %v1204_v57 = vld [vmem:[%s1474_s13 + $0x80] sm:$0xff] }
  0x99   : > { %796 = vmatmul.f32.gmra.mxu2 %v318_v2 }
  0x9b   : > { %712 = vmatmul.f32.gmra.mxu1 %v667_v10  ;;  %936 = vmatmul.f32.gmra.mxu0 %v1685_v37 }
  0xa0   : > { %871 = vmatmul.f32.gmra.mxu3 %v1591_v9 }
  0xa1   : > { %799 = vmatmul.f32.gmra.mxu2 %v319_v4 }
  0xa3   : > { %715 = vmatmul.f32.gmra.mxu1 %v668_v26  ;;  %939 = vmatmul.f32.gmra.mxu0 %v1733_v54 }
  0xa8   : > { %v390_v5 = vpop.f32.mrf.mxu1  ;;  %v378_v8 = vpop.f32.mrf.mxu0  ;;  %874 = vmatmul.f32.gmra.mxu3 %v1640_v25 }
  0xa9   : > { %802 = vmatmul.f32.gmra.mxu2 %v1180_v41 }
  0xab   : > { %718 = vmatmul.f32.gmra.mxu1 %v669_v21  ;;  %942 = vmatmul.f32.gmra.mxu0 %v1785_v11 }
  0xb0   : > { %v393_v37 = vpop.f32.mrf.mxu1  ;;  %v381_v9 = vpop.f32.mrf.mxu0  ;;  %877 = vmatmul.f32.gmra.mxu3 %v1204_v57 }
  0xb1   : > { %948 = vmatmul.f32.vlgmr.msra.gmra.mxu2 %v1879_v46 }
  0xb2   : > { %v485_v54 = vpop.f32.mrf.mxu2 }
  0xb3   : > { %721 = vmatmul.f32.gmra.mxu1 %v670_v12  ;;  %945 = vmatmul.f32.gmra.mxu0 %v1837_v30 }
  0xb4   : > { %v559_v11 = vpop.f32.mrf.mxu3 }
  0xb8   : > { %v396_v14 = vpop.f32.mrf.mxu1  ;;  %v384_v16 = vpop.f32.mrf.mxu0 }
  0xb9   : > { %951 = vmatmul.f32.gmra.mxu2 %v1228_v13 }
  0xba   : > { %v488_v25 = vpop.f32.mrf.mxu2 }
  0xbb   : > { %724 = vmatmul.f32.gmra.mxu1 %v671_v15 }
  0xbc   : > { %v562_v22 = vpop.f32.mrf.mxu3 }
  0xc0   : > { %v399_v17 = vpop.f32.mrf.mxu1  ;;  %v387_v19 = vpop.f32.mrf.mxu0 }
  0xc2   : > { %v491_v20 = vpop.f32.mrf.mxu2 }
  0xc3   : > { %727 = vmatmul.f32.gmra.mxu1 %v672_v18 }
  0xc4   : > { %v565_v30 = vpop.f32.mrf.mxu3 }
  0xc8   : > { %v419_v23 = vpop.f32.mrf.mxu1  ;;  %v633_v24 = vpop.f32.mrf.mxu0 }
  0xc9   : > { %v420_v27 = vadd.f32 %v419_v23, %v378_v8 }
  0xca   : > { %v494_v29 = vpop.f32.mrf.mxu2 }
  0xcb   : > { %v509_v28 = vadd.f32 %v485_v54, %v420_v27 }
  0xcc   : > { %v1955_v36 = vpop.f32.mrf.mxu3 }
  0xd0   : > { %v422_v31 = vpop.f32.mrf.mxu1  ;;  %v636_v32 = vpop.f32.mrf.mxu0 }
  0xd1   : > { %v423_v33 = vadd.f32 %v422_v31, %v381_v9 }
  0xd3   : > { %v510_v34 = vadd.f32 %v488_v25, %v423_v33  ;;  %v497_v35 = vpop.f32.mrf.mxu2  ;;  %v1986_v25 = vld [vmem:[%s2032_s5] ss:$0 sm:$0xff] }
  0xd5   : > { %v584_v13 = vadd.f32 %v562_v22, %v510_v34 }
  0xd7   : > { %v658_v18 = vadd.f32 %v636_v32, %v584_v13 }
  0xd8   : > { %v425_v38 = vpop.f32.mrf.mxu1  ;;  %v639_v39 = vpop.f32.mrf.mxu0 }
  0xd9   : > { %v426_v40 = vadd.f32 %v425_v38, %v384_v16  ;;  %v1957_v44 = vpop.f32.mrf.mxu3 }
  0xdb   : > { %v511_v42 = vadd.f32 %v491_v20, %v426_v40  ;;  %v500_v43 = vpop.f32.mrf.mxu2 }
  0xdd   : > { %v585_v22 = vadd.f32 %v565_v30, %v511_v42 }
  0xdf   : > { %v659_v32 = vadd.f32 %v639_v39, %v585_v22 }
  0xe0   : > { %v428_v45 = vpop.f32.mrf.mxu1  ;;  %v1959_v46 = vpop.f32.mrf.mxu0 }
  0xe1   : > { %v429_v48 = vadd.f32 %v428_v45, %v387_v19 }
  0xe2   : > { %v1961_v50 = vpop.f32.mrf.mxu3 }
  0xe3   : > { %v512_v47 = vadd.f32 %v494_v29, %v429_v48  ;;  %v503_v49 = vpop.f32.mrf.mxu2 }
  0xe5   : > { %v586_v45 = vadd.f32 %v1955_v36, %v512_v47 }
  0xe8   : > { %v431_v52 = vpop.f32.mrf.mxu1  ;;  %v1963_v51 = vpop.f32.mrf.mxu0 }
  0xe9   : > { %v432_v53 = vadd.f32 %v431_v52, %v390_v5  ;;  %v583_v5 = vadd.f32 %v559_v11, %v509_v28  ;;  %v660_v52 = vadd.f32 %v1959_v46, %v586_v45 }
  0xeb   : > { %v1965_v55 = vadd.f32 %v497_v35, %v432_v53  ;;  %v506_v56 = vpop.f32.mrf.mxu2  ;;  %v1967_v59 = vpop.f32.mrf.mxu3 }
  0xf0   : > { %v434_v61 = vpop.f32.mrf.mxu1  ;;  %v1969_v62 = vpop.f32.mrf.mxu0 }
  0xf1   : > { %v435_v63 = vadd.f32 %v434_v61, %v393_v37  ;;  %v657_v37 = vadd.f32 %v633_v24, %v583_v5 }
  0xf3   : > { %v1971_v0 = vadd.f32 %v500_v43, %v435_v63  ;;  %v782_v1 = vpop.f32.mrf.mxu2  ;;  %v1973_v60 = vpop.f32.mrf.mxu3 }
  0xf8   : > { %v437_v2 = vpop.f32.mrf.mxu1  ;;  %v1975_v3 = vpop.f32.mrf.mxu0 }
  0xf9   : > { %v438_v4 = vadd.f32 %v437_v2, %v396_v14 }
  0xfb   : > { %v1977_v6 = vadd.f32 %v503_v49, %v438_v4  ;;  %v857_v7 = vpop.f32.mrf.mxu3 }
  0xfc   : > { %v785_v58 = vpop.f32.mrf.mxu2 }
 0x100   : > { %v440_v10 = vpop.f32.mrf.mxu1  ;;  %v1979_v26 = vpop.f32.mrf.mxu0 }
 0x101   : > { %v441_v41 = vadd.f32 %v440_v10, %v399_v17 }
 0x103   : > { %v1981_v21 = vadd.f32 %v506_v56, %v441_v41  ;;  %v860_v57 = vpop.f32.mrf.mxu3 }
 0x104   : > { %v788_v8 = vpop.f32.mrf.mxu2 }
 0x108   : > { %v707_v12 = vpop.f32.mrf.mxu1  ;;  %v931_v9 = vpop.f32.mrf.mxu0 }
 0x109   : > { %v731_v54 = vadd.f32 %v707_v12, %v657_v37 }
 0x10b   : > { %v806_v14 = vadd.f32 %v782_v1, %v731_v54  ;;  %v863_v17 = vpop.f32.mrf.mxu3  ;;  %v587_v1 = vadd.f32 %v1957_v44, %v1965_v55 }
 0x10c   : > { %v791_v15 = vpop.f32.mrf.mxu2 }
 0x10d   : > { %v881_v16 = vadd.f32 %v857_v7, %v806_v14  ;;  %v661_v7 = vadd.f32 %v1963_v51, %v587_v1 }
 0x10f   : > { %v955_v11 = vadd.f32 %v931_v9, %v881_v16  ;;  %v589_v16 = vadd.f32 %v1967_v59, %v1977_v6 }
 0x110   : > { %v710_v19 = vpop.f32.mrf.mxu1  ;;  %v934_v20 = vpop.f32.mrf.mxu0 }
 0x111   : > { %v967_v23 = vadd.f32 %v1986_v25, %v955_v11  ;;  %v732_v24 = vadd.f32 %v710_v19, %v658_v18 }
 0x113   : > { %v975_v27 = vmax.f32 %v967_v23, 0.0  ;;  %v807_v28 = vadd.f32 %v785_v58, %v732_v24  ;;  %v866_v43 = vpop.f32.mrf.mxu3 }
 0x114   : > { %v794_v29 = vpop.f32.mrf.mxu2 }
 0x115   : > { %983 = vst [vmem:[%s1993_s15] sm:$0xff] %v975_v27  ;;  %v882_v31 = vadd.f32 %v860_v57, %v807_v28  ;;  %v588_v57 = vadd.f32 %v1961_v50, %v1971_v0  ;;  %v590_v27 = vadd.f32 %v1973_v60, %v1981_v21 }
 0x117   : > { %v956_v33 = vadd.f32 %v934_v20, %v882_v31  ;;  %v662_v9 = vadd.f32 %v1969_v62, %v588_v57 }
 0x118   : > { %v713_v34 = vpop.f32.mrf.mxu1  ;;  %v937_v35 = vpop.f32.mrf.mxu0 }
 0x119   : > { %v968_v38 = vadd.f32 %v1986_v25, %v956_v33  ;;  %v733_v40 = vadd.f32 %v713_v34, %v659_v32 }
 0x11b   : > { %v976_v48 = vmax.f32 %v968_v38, 0.0  ;;  %v808_v49 = vadd.f32 %v788_v8, %v733_v40  ;;  %v869_v47 = vpop.f32.mrf.mxu3 }
 0x11c   : > { %v797_v30 = vpop.f32.mrf.mxu2 }
 0x11d   : > { %984 = vst [vmem:[%s1993_s15 + $0x8] sm:$0xff] %v976_v48  ;;  %v883_v42 = vadd.f32 %v863_v17, %v808_v49  ;;  %v663_v17 = vadd.f32 %v1975_v3, %v589_v16 }
 0x11f   : > { %v957_v53 = vadd.f32 %v937_v35, %v883_v42 }
 0x120   : > { %v716_v56 = vpop.f32.mrf.mxu1  ;;  %v940_v39 = vpop.f32.mrf.mxu0 }
 0x121   : > { %v969_v61 = vadd.f32 %v1986_v25, %v957_v53  ;;  %v734_v63 = vadd.f32 %v716_v56, %v660_v52 }
 0x123   : > { %v977_v2 = vmax.f32 %v969_v61, 0.0  ;;  %v809_v36 = vadd.f32 %v791_v15, %v734_v63  ;;  %v872_v12 = vpop.f32.mrf.mxu3 }
 0x124   : > { %v800_v58 = vpop.f32.mrf.mxu2 }
 0x125   : > { %985 = vst [vmem:[%s1993_s15 + $0x10] sm:$0xff] %v977_v2  ;;  %v884_v4 = vadd.f32 %v866_v43, %v809_v36 }
 0x127   : > { %v958_v10 = vadd.f32 %v940_v39, %v884_v4 }
 0x128   : > { %v719_v46 = vpop.f32.mrf.mxu1  ;;  %v943_v8 = vpop.f32.mrf.mxu0 }
 0x129   : > { %v970_v41 = vadd.f32 %v1986_v25, %v958_v10  ;;  %v735_v5 = vadd.f32 %v719_v46, %v661_v7 }
 0x12b   : > { %v978_v44 = vmax.f32 %v970_v41, 0.0  ;;  %v810_v55 = vadd.f32 %v794_v29, %v735_v5  ;;  %v875_v62 = vpop.f32.mrf.mxu3  ;;  %v664_v29 = vadd.f32 %v1979_v26, %v590_v27 }
 0x12c   : > { %v803_v51 = vpop.f32.mrf.mxu2 }
 0x12d   : > { %986 = vst [vmem:[%s1993_s15 + $0x18] sm:$0xff] %v978_v44  ;;  %v885_v37 = vadd.f32 %v869_v47, %v810_v55 }
 0x12f   : > { %v959_v54 = vadd.f32 %v943_v8, %v885_v37 }
 0x130   : > { %v722_v13 = vpop.f32.mrf.mxu1  ;;  %v946_v0 = vpop.f32.mrf.mxu0 }
 0x131   : > { %v971_v14 = vadd.f32 %v1986_v25, %v959_v54  ;;  %v736_v15 = vadd.f32 %v722_v13, %v662_v9 }
 0x133   : > { %v979_v18 = vmax.f32 %v971_v14, 0.0  ;;  %v811_v50 = vadd.f32 %v797_v30, %v736_v15  ;;  %v878_v34 = vpop.f32.mrf.mxu3 }
 0x134   : > { %v949_v22 = vpop.f32.mrf.mxu2 }
 0x135   : > { %987 = vst [vmem:[%s1993_s15 + $0x20] sm:$0xff] %v979_v18  ;;  %v886_v11 = vadd.f32 %v872_v12, %v811_v50 }
 0x137   : > { %v960_v19 = vadd.f32 %v946_v0, %v886_v11 }
 0x138   : > { %v725_v20 = vpop.f32.mrf.mxu1 }
 0x139   : > { %v972_v23 = vadd.f32 %v1986_v25, %v960_v19  ;;  %v737_v24 = vadd.f32 %v725_v20, %v663_v17 }
 0x13b   : > { %v980_v59 = vmax.f32 %v972_v23, 0.0  ;;  %v812_v6 = vadd.f32 %v800_v58, %v737_v24 }
 0x13c   : > { %v952_v40 = vpop.f32.mrf.mxu2 }
 0x13d   : > { %988 = vst [vmem:[%s1993_s15 + $0x28] sm:$0xff] %v980_v59  ;;  %v887_v28 = vadd.f32 %v875_v62, %v812_v6 }
 0x13f   : > { %v961_v31 = vadd.f32 %v949_v22, %v887_v28 }
 0x140   : > { %v728_v3 = vpop.f32.mrf.mxu1 }
 0x141   : > { %v973_v32 = vadd.f32 %v1986_v25, %v961_v31  ;;  %v738_v33 = vadd.f32 %v728_v3, %v664_v29 }
 0x143   : > { %v981_v35 = vmax.f32 %v973_v32, 0.0  ;;  %v813_v38 = vadd.f32 %v803_v51, %v738_v33 }
 0x145   : > { %989 = vst [vmem:[%s1993_s15 + $0x30] sm:$0xff] %v981_v35  ;;  %v888_v43 = vadd.f32 %v878_v34, %v813_v38 }
 0x147   : > { %v962_v45 = vadd.f32 %v952_v40, %v888_v43 }
 0x149   : > { %v974_v60 = vadd.f32 %v1986_v25, %v962_v45 }
 0x14b   : > { %v982_v21 = vmax.f32 %v974_v60, 0.0 }
 0x14d   : > { %990 = vst [vmem:[%s1993_s15 + $0x38] sm:$0xff] %v982_v21 }
 0x14e PF: > { %s16_s21 = sadd.s32 1, %s1296_s21  }
 0x14f   : > { %p13_p4 = scmp.ge.s32.totalorder %s16_s21, 4  }
 0x151   :  { %15 = sbr.rel (!%p13_p4) target bundleno = 1 (0x1), region = 93 }

</bundles_post_ra>
